<compile_context>
chip_gen: v7x
topology: tpu7x:2x2x1
jax: 0.10.0
libtpu: 0.0.40
codegen_flags: <defaults>
</compile_context>

<pallas_src>
import functools

import jax
import jax.numpy as jnp
from jax.experimental import pallas as pl
from jax.experimental.pallas import tpu as pltpu


# ------------------------ VMEM budget (generation-aware) ---------------------

def _vmem_budget_bytes():
    """Scoped-VMEM budget with headroom, aware of the chip generation."""
    phys = 64 << 20                       # conservative default (v7x per-TC VMEM)
    try:
        info = pltpu.get_tpu_info()
        phys = int(getattr(info, "vmem_capacity_bytes", phys))
    except Exception:
        pass
    if phys <= (64 << 20):
        return 48 << 20                   # v7x: 64 MiB physical  -> ~48 MiB scoped
    return 96 << 20                       # v5e/v6e: 128 MiB physical -> 96 MiB scoped


# ----------------------------- tile selection --------------------------------

_TM_CANDIDATES = (512, 256, 128, 64, 32, 16)   # multiples of 16 (bf16 sublane packing)
_TJ_CANDIDATES = (2048, 1024, 512, 256, 128)   # lane-axis tiles over the intermediate dim


def _fused_vmem_bytes(tm, tj, K, H, itemsize, nj):
    """Estimated VMEM footprint of the fused kernel (double-buffered pipeline)."""
    x_t = tm * K * itemsize
    wgu_t = K * (2 * tj) * itemsize
    wd_t = tj * H * itemsize
    out_t = tm * H * itemsize
    acc = tm * H * 4 if nj > 1 else 0
    return 2 * (x_t + wgu_t + wd_t + out_t) + acc


def _pick_tm(M):
    for c in _TM_CANDIDATES:
        if M % c == 0:
            return c
    return M   # tiny / ragged decode batches: full dim (Mosaic pads internally)


def _pick_tj(tm, K, I, H, itemsize, budget):
    for c in _TJ_CANDIDATES:
        if I % c == 0 and _fused_vmem_bytes(tm, c, K, H, itemsize, I // c) <= budget:
            return c
    return I   # last resort: whole intermediate dim in one step


# -------------------------- weight column repacking --------------------------

def _repack_gate_up(w_gate_up, intermediate_size, tj):
    """Repack (K, 2I) = [gate | up] so gate tile j and up tile j are adjacent.

    After repacking, column block j of width 2*tj is [gate_j | up_j], so one
    BlockSpec / one DMA stream / one MXU dot covers both projections.
    In production this is done once at weight-load time.
    """
    K, _ = w_gate_up.shape
    I = intermediate_size
    nj = I // tj
    wg = w_gate_up[:, :I].reshape(K, nj, tj)
    wu = w_gate_up[:, I:].reshape(K, nj, tj)
    return jnp.stack([wg, wu], axis=2).reshape(K, 2 * I)


# ------------------------------- kernel bodies --------------------------------

def _fused_mlp_kernel(x_ref, w_gu_ref, w_dn_ref, o_ref, acc_ref, *, tj):
    """Per step: (tm, K) @ (K, 2*tj) -> silu(g)*u -> @ (tj, H) into f32 acc."""
    j = pl.program_id(1)

    @pl.when(j == 0)
    def _():
        acc_ref[...] = jnp.zeros_like(acc_ref)

    gu = jnp.dot(x_ref[...], w_gu_ref[...], preferred_element_type=jnp.float32)
    g = gu[:, :tj]                       # 128-aligned static split
    u = gu[:, tj:]
    h = (g * jax.lax.logistic(g) * u).astype(w_dn_ref.dtype)   # bf16 slab, VMEM-only
    acc_ref[...] += jnp.dot(h, w_dn_ref[...], preferred_element_type=jnp.float32)

    @pl.when(j == pl.num_programs(1) - 1)
    def _():
        o_ref[...] = acc_ref[...].astype(o_ref.dtype)


def _fused_mlp_kernel_single(x_ref, w_gu_ref, w_dn_ref, o_ref, *, tj):
    """Degenerate reduction (single intermediate block): no grid axis, no acc."""
    gu = jnp.dot(x_ref[...], w_gu_ref[...], preferred_element_type=jnp.float32)
    g = gu[:, :tj]
    u = gu[:, tj:]
    h = (g * jax.lax.logistic(g) * u).astype(w_dn_ref.dtype)
    o_ref[...] = jnp.dot(h, w_dn_ref[...],
                         preferred_element_type=jnp.float32).astype(o_ref.dtype)


# --------------------------------- Qwen3MLP -----------------------------------

def qwen3_mlp_forward(x, gate_up_w, down_w, intermediate_size, *, tm=None, tj=None):
    """x: (T, hidden); gate_up_w: (hidden, 2*I) = [gate | up]; down_w: (I, hidden)."""
    M, K = x.shape
    Kw, N2 = gate_up_w.shape
    I = intermediate_size
    Iw, H = down_w.shape
    assert Kw == K and N2 == 2 * I and Iw == I

    itemsize = jnp.dtype(x.dtype).itemsize
    budget = _vmem_budget_bytes()

    tm = tm or _pick_tm(M)
    if tj is None:
        tj = _pick_tj(tm, K, I, H, itemsize, budget)
    assert M % tm == 0 and I % tj == 0
    nj = I // tj

    w_gu_packed = _repack_gate_up(gate_up_w, I, tj)

    cost = pl.CostEstimate(
        flops=int(2.0 * M * (2 * I) * K + 2.0 * M * I * H + 3.0 * M * I),
        transcendentals=int(M * I),
        bytes_accessed=int((M * K + K * 2 * I + I * H + M * H) * itemsize),
    )
    compiler_params = lambda sem: pltpu.CompilerParams(
        dimension_semantics=sem, vmem_limit_bytes=budget)

    # TODO(synk): pipeline_mode=pl.Buffered(3) on the weight BlockSpecs (when the
    # VMEM budget allows) would further hide per-step DMA issue latency on v7x.
    # TODO(synk): decode (M//tm == 1) runs on a single TensorCore on v7x; splitting
    # the intermediate reduction across cores needs a cross-core reduction and is
    # not worth it in the HBM-bound regime.

    if nj == 1:
        kernel = functools.partial(_fused_mlp_kernel_single, tj=tj)
        return pl.pallas_call(
            kernel,
            grid=(M // tm,),
            in_specs=[
                pl.BlockSpec((tm, K), lambda i: (i, 0)),        # x row tile
                pl.BlockSpec((K, 2 * tj), lambda i: (0, 0)),    # [gate | up] (whole)
                pl.BlockSpec((tj, H), lambda i: (0, 0)),        # down_proj (whole)
            ],
            out_specs=pl.BlockSpec((tm, H), lambda i: (i, 0)),
            out_shape=jax.ShapeDtypeStruct((M, H), x.dtype),
            compiler_params=compiler_params(("parallel",)),
            cost_estimate=cost,
        )(x, w_gu_packed, down_w)

    kernel = functools.partial(_fused_mlp_kernel, tj=tj)
    return pl.pallas_call(
        kernel,
        grid=(M // tm, nj),
        in_specs=[
            pl.BlockSpec((tm, K), lambda i, j: (i, 0)),         # x row tile (resident over j)
            pl.BlockSpec((K, 2 * tj), lambda i, j: (0, j)),     # [gate_j | up_j] packed cols
            pl.BlockSpec((tj, H), lambda i, j: (j, 0)),         # down_proj rows j
        ],
        out_specs=pl.BlockSpec((tm, H), lambda i, j: (i, 0)),
        out_shape=jax.ShapeDtypeStruct((M, H), x.dtype),
        scratch_shapes=[pltpu.VMEM((tm, H), jnp.float32)],
        compiler_params=compiler_params(("parallel", "arbitrary")),
        cost_estimate=cost,
    )(x, w_gu_packed, down_w)


# -------------------------------- reference -----------------------------------

def _reference_mlp(x, gate_up_w, down_w, intermediate_size):
    xf = x.astype(jnp.float32)
    gu = jnp.dot(xf, gate_up_w.astype(jnp.float32))
    g, u = gu[:, :intermediate_size], gu[:, intermediate_size:]
    h = g * jax.nn.sigmoid(g) * u
    return jnp.dot(h, down_w.astype(jnp.float32))


# ----------------------------------- main --------------------------------------

if __name__ == "__main__":
    T = 128                 # tokens
    hidden = 256            # hidden_size
    inter = 512             # intermediate_size
    dtype = jnp.bfloat16

    root = jax.random.PRNGKey(0)
    kx, kg, kd = jax.random.split(root, 3)

    x = jax.random.normal(kx, (T, hidden), dtype=jnp.float32).astype(dtype)
    gate_up_w = (0.02 * jax.random.normal(kg, (hidden, 2 * inter),
                                          dtype=jnp.float32)).astype(dtype)
    down_w = (0.02 * jax.random.normal(kd, (inter, hidden),
                                       dtype=jnp.float32)).astype(dtype)

    ref = _reference_mlp(x, gate_up_w, down_w, inter)

    # Default tiles (at this size: single intermediate block -> no-accumulator path).
    out = jax.block_until_ready(qwen3_mlp_forward(x, gate_up_w, down_w, inter))
    assert out.shape == (T, hidden)
    assert bool(jnp.all(jnp.isfinite(out.astype(jnp.float32))))
    assert bool(jnp.allclose(out.astype(jnp.float32), ref, atol=2e-3, rtol=5e-2)), \
        "Pallas fused MLP (single-block path) mismatch vs reference"

    # Forced small intermediate tile -> exercises the multi-step reduction path.
    out2 = jax.block_until_ready(qwen3_mlp_forward(x, gate_up_w, down_w, inter, tj=128))
    assert bool(jnp.allclose(out2.astype(jnp.float32), ref, atol=2e-3, rtol=5e-2)), \
        "Pallas fused MLP (multi-block reduction path) mismatch vs reference"

    print("KERNEL_OK")
</pallas_src>

<mosaic_0001>
module attributes {stable_mosaic.version = 11 : i64} {
  func.func @_fused_mlp_kernel_single(%arg0: i32, %arg1: memref<128x256xbf16, #tpu.memory_space<vmem>>, %arg2: memref<256x1024xbf16, #tpu.memory_space<vmem>>, %arg3: memref<512x256xbf16, #tpu.memory_space<vmem>>, %arg4: memref<128x256xbf16, #tpu.memory_space<vmem>>) attributes {dimension_semantics = [#tpu.dimension_semantics<parallel>], iteration_bounds = array<i64: 1>, scalar_prefetch = 0 : i64, scratch_operands = 0 : i64, tpu.core_type = #tpu.core_type<tc>, window_params = [{transform_indices = @transform_0, window_bounds = array<i64: 128, 256>}, {pipeline_mode = #tpu.pipeline_mode<synchronous>, transform_indices = @transform_1, window_bounds = array<i64: 256, 1024>}, {pipeline_mode = #tpu.pipeline_mode<synchronous>, transform_indices = @transform_2, window_bounds = array<i64: 512, 256>}, {transform_indices = @transform_3, window_bounds = array<i64: 128, 256>}]} {
    %c0 = arith.constant 0 : index
    %c0_0 = arith.constant 0 : index
    %0 = vector.load %arg1[%c0, %c0_0] : memref<128x256xbf16, #tpu.memory_space<vmem>>, vector<128x256xbf16>
    %c0_1 = arith.constant 0 : index
    %c0_2 = arith.constant 0 : index
    %1 = vector.load %arg2[%c0_1, %c0_2] : memref<256x1024xbf16, #tpu.memory_space<vmem>>, vector<256x1024xbf16>
    %cst = arith.constant dense<0.000000e+00> : vector<128x1024xf32>
    %2 = tpu.matmul %0, %1, %cst {dimension_numbers = #tpu.dot_dimension_numbers<[1], [0], [0], [1], [0, 0, 1, 1], [], []>} : vector<128x256xbf16>, vector<256x1024xbf16>, vector<128x1024xf32> -> vector<128x1024xf32>
    %3 = vector.extract_strided_slice %2 {offsets = [0, 0], sizes = [128, 512], strides = [1, 1]} : vector<128x1024xf32> to vector<128x512xf32>
    %4 = vector.extract_strided_slice %2 {offsets = [0, 512], sizes = [128, 512], strides = [1, 1]} : vector<128x1024xf32> to vector<128x512xf32>
    %5 = arith.negf %3 : vector<128x512xf32>
    %6 = math.exp %5 : vector<128x512xf32>
    %cst_3 = arith.constant 1.000000e+00 : f32
    %7 = vector.broadcast %cst_3 : f32 to vector<128x512xf32>
    %8 = arith.addf %7, %6 : vector<128x512xf32>
    %9 = arith.divf %7, %8 : vector<128x512xf32>
    %10 = arith.mulf %3, %9 : vector<128x512xf32>
    %11 = arith.mulf %10, %4 : vector<128x512xf32>
    %12 = arith.truncf %11 : vector<128x512xf32> to vector<128x512xbf16>
    %c0_4 = arith.constant 0 : index
    %c0_5 = arith.constant 0 : index
    %13 = vector.load %arg3[%c0_4, %c0_5] : memref<512x256xbf16, #tpu.memory_space<vmem>>, vector<512x256xbf16>
    %cst_6 = arith.constant dense<0.000000e+00> : vector<128x256xf32>
    %14 = tpu.matmul %12, %13, %cst_6 {dimension_numbers = #tpu.dot_dimension_numbers<[1], [0], [0], [1], [0, 0, 1, 1], [], []>} : vector<128x512xbf16>, vector<512x256xbf16>, vector<128x256xf32> -> vector<128x256xf32>
    %15 = arith.truncf %14 : vector<128x256xf32> to vector<128x256xbf16>
    %c0_7 = arith.constant 0 : index
    %c0_8 = arith.constant 0 : index
    %16 = vector.load %arg4[%c0_7, %c0_8] : memref<128x256xbf16, #tpu.memory_space<vmem>>, vector<128x256xbf16>
    tpu.vector_store %arg4[%c0_7, %c0_8], %15 {strides = array<i32>} : memref<128x256xbf16, #tpu.memory_space<vmem>>, vector<128x256xbf16>,
    return
  }
  func.func @transform_0(%arg0: i32) -> (i32, i32) {
    %c0_i32 = arith.constant 0 : i32
    %c0_i32_0 = arith.constant 0 : i32
    return %arg0, %c0_i32 : i32, i32
  }
  func.func @transform_1(%arg0: i32) -> (i32, i32) {
    %c0_i32 = arith.constant 0 : i32
    %c0_i32_0 = arith.constant 0 : i32
    %c0_i32_1 = arith.constant 0 : i32
    return %c0_i32, %c0_i32_0 : i32, i32
  }
  func.func @transform_2(%arg0: i32) -> (i32, i32) {
    %c0_i32 = arith.constant 0 : i32
    %c0_i32_0 = arith.constant 0 : i32
    %c0_i32_1 = arith.constant 0 : i32
    return %c0_i32, %c0_i32_0 : i32, i32
  }
  func.func @transform_3(%arg0: i32) -> (i32, i32) {
    %c0_i32 = arith.constant 0 : i32
    %c0_i32_0 = arith.constant 0 : i32
    return %arg0, %c0_i32 : i32, i32
  }
}

</mosaic_0001>

<bundles_post_ra>
// kernel: tpu_custom_call.1
= control target key start
LH: loop header
LB: loop body
LE: loop exit
PB: predicated region body
PF: predicated region fallthrough
CT: control target
= control target key end

     0   :  { %8 = vsyncpa [#allocation3], 0  ;;  %s4003_s0 = inlined_call_operand.hbm [shape: bf16[128,256], index: 0, kind: input, shape index: {}]   ;;  %s4004_s1 = inlined_call_operand.hbm [shape: bf16[256,1024], index: 1, kind: input, shape index: {}]   ;;  %s4005_s2 = inlined_call_operand.hbm [shape: bf16[512,256], index: 2, kind: input, shape index: {}]   ;;  %s4006_s3 = inlined_call_operand.hbm [shape: bf16[128,256], index: 3, kind: output, shape index: {}]  }
   0x1   :  { %9 = vsyncpa [#allocation6], 0 }
   0x2   :  { %10 = vsyncpa [#allocation4], 0  ;;  %s3471_s12 = smov [#allocation5]   ;;  %s3377_s16 = scalar_lea.hbm %s4004_s1, 16384 }
   0x3   :  { %s28_s13 = sshll.u32 %s3471_s12, 4  ;;  %p3378_p0 = scmp.ne.s32.totalorder %s4004_s1, %s3377_s16  ;;  %s29_s13 = int_to_ptr.vmem [resolvable:$true] %s28_s13 }
   0x4   :  { %p3381_p1 = scmp.lt.u32.totalorder %s3377_s16, %s4004_s1 }
   0x6   :  { %p3383_p2 = pnand %p3381_p1, %p3378_p0 }
   0x8   :  { %3386 = shalt.err (!%p3383_p2)
}
   0x9   :  { %s3387_s21 = scalar_lea.vmem %s29_s13, 16384  ;;  %p3392_p4 = scmp.lt.s32.totalorder %s29_s13, %s29_s13 }
   0xa   :  { %p3388_p3 = scmp.ne.s32.totalorder %s29_s13, %s3387_s21  ;;  %p3393_p5 = scmp.lt.s32.totalorder %s3387_s21, %s3387_s21 }
   0xc   :  { %p3394_p6 = por %p3393_p5, %p3392_p4 }
   0xe   :  { %p3395_p7 = pnand %p3394_p6, %p3388_p3 }
  0x10   :  { %3398 = shalt.err (!%p3395_p7)
}
  0x11   :  { %s3472_s22 = smov 512   ;;  %s3473_s23 = smov 32  }
  0x12   :  { %34 = dma.hbm_to_vmem [thread:$0]  %s4004_s1, 16384, %s29_s13, [#allocation6], %s3472_s22, %s3472_s22, %s3473_s23  }
  0x13   :  { %s3474_s26 = smov [#allocation2]   ;;  %s3399_s30 = scalar_lea.hbm %s4003_s0, 2048 }
  0x14   :  { %s16_s27 = sshll.u32 %s3474_s26, 4  ;;  %p3400_p8 = scmp.ne.s32.totalorder %s4003_s0, %s3399_s30  ;;  %s17_s27 = int_to_ptr.vmem [resolvable:$true] %s16_s27 }
  0x15   :  { %p3403_p9 = scmp.lt.u32.totalorder %s3399_s30, %s4003_s0 }
  0x17   :  { %p3405_p10 = pnand %p3403_p9, %p3400_p8 }
  0x19   :  { %3408 = shalt.err (!%p3405_p10)
}
  0x1a   :  { %s3409_s8 = scalar_lea.vmem %s17_s27, 2048  ;;  %p3414_p12 = scmp.lt.s32.totalorder %s17_s27, %s17_s27 }
  0x1b   :  { %p3410_p11 = scmp.ne.s32.totalorder %s17_s27, %s3409_s8  ;;  %p3415_p13 = scmp.lt.s32.totalorder %s3409_s8, %s3409_s8 }
  0x1d   :  { %p3416_p0 = por %p3415_p13, %p3414_p12 }
  0x1f   :  { %p3417_p1 = pnand %p3416_p0, %p3410_p11 }
  0x21   :  { %3420 = shalt.err (!%p3417_p1)
}
  0x22   :  { %s3475_s1 = smov 128   ;;  %s3476_s9 = smov 8  }
  0x23   :  { %22 = dma.hbm_to_vmem [thread:$0]  %s4003_s0, 2048, %s17_s27, [#allocation3], %s3475_s1, %s3475_s1, %s3476_s9  }
  0x24   :  { %s3477_s12 = smov [#allocation7]   ;;  %s3421_s16 = scalar_lea.hbm %s4005_s2, 8192 }
  0x25   :  { %s40_s13 = sshll.u32 %s3477_s12, 4  ;;  %p3422_p2 = scmp.ne.s32.totalorder %s4005_s2, %s3421_s16  ;;  %s41_s13 = int_to_ptr.vmem [resolvable:$true] %s40_s13 }
  0x26   :  { %p3425_p3 = scmp.lt.u32.totalorder %s3421_s16, %s4005_s2 }
  0x28   :  { %p3427_p4 = pnand %p3425_p3, %p3422_p2 }
  0x2a   :  { %3430 = shalt.err (!%p3427_p4)
}
  0x2b   :  { %s3431_s21 = scalar_lea.vmem %s41_s13, 8192  ;;  %p3436_p6 = scmp.lt.s32.totalorder %s41_s13, %s41_s13 }
  0x2c   :  { %p3432_p5 = scmp.ne.s32.totalorder %s41_s13, %s3431_s21  ;;  %p3437_p7 = scmp.lt.s32.totalorder %s3431_s21, %s3431_s21 }
  0x2e   :  { %p3438_p8 = por %p3437_p7, %p3436_p6 }
  0x30   :  { %p3439_p9 = pnand %p3438_p8, %p3432_p5 }
  0x32   :  { %3442 = shalt.err (!%p3439_p9)
}
  0x33   :  { %46 = dma.hbm_to_vmem [thread:$0]  %s4005_s2, 8192, %s41_s13, [#allocation6], %s3475_s1, %s3475_s1, %s3476_s9  }
  0x34   :  { %3465 = dma.done.wait [#allocation3], 2048  }
  0x35   :  { %3466 = vsyncadd [#allocation3], 4294965248 }
  0x36   :  { %3467 = dma.done.wait [#allocation6], 24576  }
  0x37   :  { %3468 = vsyncadd [#allocation6], 4294942720  ;;  %v72_v0 = vld [vmem:[#allocation5] sm:$0xff]  ;;  %v74_v11 = vld [vmem:[#allocation5 + $0x10] sm:$0xff]  ;;  %s3478_s2 = smov [#allocation8]  }
  0x38   :  { %v76_v1 = vld [vmem:[#allocation5 + $0x20] sm:$0xff]  ;;  %v78_v12 = vld [vmem:[#allocation5 + $0x30] sm:$0xff]  ;;  %s2643_s23 = sshll.u32 %s3478_s2, 4  ;;  %s2644_s23 = int_to_ptr.vmem [resolvable:$true] %s2643_s23 }
  0x39   :  { %v80_v2 = vld [vmem:[#allocation5 + $0x40] sm:$0xff]  ;;  %v2673_v3 = vcombine.high %v72_v0, %v76_v1  ;;  %v2672_v4 = vcombine.low %v72_v0, %v76_v1  ;;  %v2677_v15 = vcombine.high %v74_v11, %v78_v12  ;;  %v2676_v16 = vcombine.low %v74_v11, %v78_v12  ;;  %v82_v17 = vld [vmem:[#allocation5 + $0x50] sm:$0xff]  ;;  %s3443_s24 = scalar_lea.vmem %s2644_s23, 2048  ;;  %p3448_p11 = scmp.lt.s32.totalorder %s2644_s23, %s2644_s23 }
  0x3a   :  { %v84_v5 = vld [vmem:[#allocation5 + $0x60] sm:$0xff]  ;;  %v86_v18 = vld [vmem:[#allocation5 + $0x70] sm:$0xff]  ;;  %p3444_p10 = scmp.ne.s32.totalorder %s2644_s23, %s3443_s24  ;;  %p3449_p12 = scmp.lt.s32.totalorder %s3443_s24, %s3443_s24 }
  0x3b   :  { %v2681_v6 = vcombine.high %v80_v2, %v84_v5  ;;  %v88_v7 = vld [vmem:[#allocation5 + $0x80] sm:$0xff]  ;;  %920 = vmatprep.subr.bf16.mxu1 %v2673_v3  ;;  %v2680_v9 = vcombine.low %v80_v2, %v84_v5  ;;  %1146 = vmatprep.subr.bf16.mxu0 %v2677_v15  ;;  %v2685_v20 = vcombine.high %v82_v17, %v86_v18  ;;  %v90_v21 = vld [vmem:[#allocation5 + $0x90] sm:$0xff] }
  0x3c   :  { %v92_v8 = vld [vmem:[#allocation5 + $0xa0] sm:$0xff]  ;;  %921 = vmatpush1.bf16.msra.mxu1 %v2672_v4  ;;  %v94_v22 = vld [vmem:[#allocation5 + $0xb0] sm:$0xff]  ;;  %1147 = vmatpush1.bf16.msra.mxu0 %v2676_v16  ;;  %v2684_v24 = vcombine.low %v82_v17, %v86_v18  ;;  %p3450_p13 = por %p3449_p12, %p3448_p11 }
  0x3d   :  { %922 = vmatprep.subr.bf16.mxu1 %v2681_v6  ;;  %v2689_v10 = vcombine.high %v88_v7, %v92_v8  ;;  %v96_v13 = vld [vmem:[#allocation5 + $0xc0] sm:$0xff]  ;;  %v2688_v19 = vcombine.low %v88_v7, %v92_v8  ;;  %1148 = vmatprep.subr.bf16.mxu0 %v2685_v20  ;;  %v2693_v27 = vcombine.high %v90_v21, %v94_v22  ;;  %v98_v28 = vld [vmem:[#allocation5 + $0xd0] sm:$0xff] }
  0x3e   :  { %v100_v14 = vld [vmem:[#allocation5 + $0xe0] sm:$0xff]  ;;  %v102_v29 = vld [vmem:[#allocation5 + $0xf0] sm:$0xff]  ;;  %v2692_v32 = vcombine.low %v90_v21, %v94_v22  ;;  %p3451_p0 = pnand %p3450_p13, %p3444_p10 }
  0x3f   :  { %v2697_v23 = vcombine.high %v96_v13, %v100_v14  ;;  %v104_v25 = vld [vmem:[#allocation5 + $0x100] sm:$0xff]  ;;  %v2696_v30 = vcombine.low %v96_v13, %v100_v14  ;;  %v2701_v35 = vcombine.high %v98_v28, %v102_v29  ;;  %v106_v36 = vld [vmem:[#allocation5 + $0x110] sm:$0xff]  ;;  %v2700_v40 = vcombine.low %v98_v28, %v102_v29 }
  0x40   :  { %923 = vmatpush1.bf16.msra.mxu1 %v2680_v9  ;;  %v108_v26 = vld [vmem:[#allocation5 + $0x120] sm:$0xff]  ;;  %1149 = vmatpush1.bf16.msra.mxu0 %v2684_v24  ;;  %v110_v37 = vld [vmem:[#allocation5 + $0x130] sm:$0xff] }
  0x41   :  { %924 = vmatprep.subr.bf16.mxu1 %v2689_v10  ;;  %v2705_v31 = vcombine.high %v104_v25, %v108_v26  ;;  %v112_v33 = vld [vmem:[#allocation5 + $0x140] sm:$0xff]  ;;  %1150 = vmatprep.subr.bf16.mxu0 %v2693_v27  ;;  %v2704_v38 = vcombine.low %v104_v25, %v108_v26  ;;  %v2709_v44 = vcombine.high %v106_v36, %v110_v37  ;;  %v114_v45 = vld [vmem:[#allocation5 + $0x150] sm:$0xff] }
  0x42   :  { %v116_v34 = vld [vmem:[#allocation5 + $0x160] sm:$0xff]  ;;  %v118_v46 = vld [vmem:[#allocation5 + $0x170] sm:$0xff]  ;;  %v2708_v49 = vcombine.low %v106_v36, %v110_v37 }
  0x43   :  { %v2713_v39 = vcombine.high %v112_v33, %v116_v34  ;;  %v3541_v41 = vld [vmem:[#allocation2 + $0x4] ss:$8 sps:$4 sm:$0xff]   ;;  %v2712_v47 = vcombine.low %v112_v33, %v116_v34  ;;  %v2717_v52 = vcombine.high %v114_v45, %v118_v46  ;;  %v122_v53 = vld [vmem:[#allocation5 + $0x190] sm:$0xff]  ;;  %v2716_v57 = vcombine.low %v114_v45, %v118_v46 }
  0x44   :  { %925 = vmatpush1.bf16.msra.mxu1 %v2688_v19  ;;  %1151 = vmatpush1.bf16.msra.mxu0 %v2692_v32  ;;  %v120_v42 = vld [vmem:[#allocation5 + $0x180] sm:$0xff]  ;;  %v126_v54 = vld [vmem:[#allocation5 + $0x1b0] sm:$0xff] }
  0x45   :  { %926 = vmatprep.subr.bf16.mxu1 %v2697_v23  ;;  %v124_v43 = vld [vmem:[#allocation5 + $0x1a0] sm:$0xff]  ;;  %1152 = vmatprep.subr.bf16.mxu0 %v2701_v35  ;;  %v2725_v60 = vcombine.high %v122_v53, %v126_v54  ;;  %v130_v61 = vld [vmem:[#allocation5 + $0x1d0] sm:$0xff]  ;;  %v2724_v1 = vcombine.low %v122_v53, %v126_v54 }
  0x46   :  { %952 = vmatprep.mubr.bf16.mxu1 %v3541_v41  ;;  %1178 = vmatprep.mubr.bf16.mxu0 %v3541_v41  ;;  %v2721_v48 = vcombine.high %v120_v42, %v124_v43  ;;  %v128_v50 = vld [vmem:[#allocation5 + $0x1c0] sm:$0xff]  ;;  %v2720_v55 = vcombine.low %v120_v42, %v124_v43  ;;  %v134_v62 = vld [vmem:[#allocation5 + $0x1f0] sm:$0xff] }
  0x47   :  { %v132_v51 = vld [vmem:[#allocation5 + $0x1e0] sm:$0xff]  ;;  %v2733_v4 = vcombine.high %v130_v61, %v134_v62  ;;  %v138_v5 = vld [vmem:[#allocation5 + $0x210] sm:$0xff]  ;;  %v2732_v9 = vcombine.low %v130_v61, %v134_v62 }
  0x48   :  { %927 = vmatpush1.bf16.msra.mxu1 %v2696_v30  ;;  %1153 = vmatpush1.bf16.msra.mxu0 %v2700_v40  ;;  %v2729_v56 = vcombine.high %v128_v50, %v132_v51  ;;  %v136_v58 = vld [vmem:[#allocation5 + $0x200] sm:$0xff]  ;;  %v2728_v63 = vcombine.low %v128_v50, %v132_v51  ;;  %v142_v6 = vld [vmem:[#allocation5 + $0x230] sm:$0xff] }
  0x49   :  { %928 = vmatprep.subr.bf16.mxu1 %v2705_v31  ;;  %1154 = vmatprep.subr.bf16.mxu0 %v2709_v44  ;;  %v140_v59 = vld [vmem:[#allocation5 + $0x220] sm:$0xff]  ;;  %v2741_v12 = vcombine.high %v138_v5, %v142_v6  ;;  %v146_v13 = vld [vmem:[#allocation5 + $0x250] sm:$0xff]  ;;  %v2740_v17 = vcombine.low %v138_v5, %v142_v6 }
  0x4a   :  { %v2737_v0 = vcombine.high %v136_v58, %v140_v59  ;;  %v144_v2 = vld [vmem:[#allocation5 + $0x240] sm:$0xff]  ;;  %v2736_v7 = vcombine.low %v136_v58, %v140_v59  ;;  %v150_v14 = vld [vmem:[#allocation5 + $0x270] sm:$0xff]  ;;  %v77_v58 = vld [vmem:[#allocation5 + $0x28] sm:$0xff] }
  0x4b   :  { %v148_v3 = vld [vmem:[#allocation5 + $0x260] sm:$0xff]  ;;  %v2749_v20 = vcombine.high %v146_v13, %v150_v14  ;;  %v154_v21 = vld [vmem:[#allocation5 + $0x290] sm:$0xff]  ;;  %v2748_v25 = vcombine.low %v146_v13, %v150_v14  ;;  %v97_v14 = vld [vmem:[#allocation5 + $0xc8] sm:$0xff] }
  0x4c   :  { %929 = vmatpush1.bf16.msra.mxu1 %v2704_v38  ;;  %1155 = vmatpush1.bf16.msra.mxu0 %v2708_v49  ;;  %v2745_v8 = vcombine.high %v144_v2, %v148_v3  ;;  %v152_v10 = vld [vmem:[#allocation5 + $0x280] sm:$0xff]  ;;  %v2744_v15 = vcombine.low %v144_v2, %v148_v3  ;;  %v158_v22 = vld [vmem:[#allocation5 + $0x2b0] sm:$0xff]  ;;  %v85_v2 = vld [vmem:[#allocation5 + $0x68] sm:$0xff] }
  0x4d   :  { %930 = vmatprep.subr.bf16.mxu1 %v2713_v39  ;;  %1156 = vmatprep.subr.bf16.mxu0 %v2717_v52  ;;  %v156_v11 = vld [vmem:[#allocation5 + $0x2a0] sm:$0xff]  ;;  %v2757_v28 = vcombine.high %v154_v21, %v158_v22  ;;  %v162_v29 = vld [vmem:[#allocation5 + $0x2d0] sm:$0xff]  ;;  %v2756_v33 = vcombine.low %v154_v21, %v158_v22  ;;  %v109_v22 = vld [vmem:[#allocation5 + $0x128] sm:$0xff] }
  0x4e   :  { %v2753_v16 = vcombine.high %v152_v10, %v156_v11  ;;  %v160_v18 = vld [vmem:[#allocation5 + $0x2c0] sm:$0xff]  ;;  %v2752_v23 = vcombine.low %v152_v10, %v156_v11  ;;  %v166_v30 = vld [vmem:[#allocation5 + $0x2f0] sm:$0xff]  ;;  %v93_v10 = vld [vmem:[#allocation5 + $0xa8] sm:$0xff] }
  0x4f   :  { %v164_v19 = vld [vmem:[#allocation5 + $0x2e0] sm:$0xff]  ;;  %v2765_v36 = vcombine.high %v162_v29, %v166_v30  ;;  %v170_v37 = vld [vmem:[#allocation5 + $0x310] sm:$0xff]  ;;  %v2764_v42 = vcombine.low %v162_v29, %v166_v30 }
  0x50   :  { %931 = vmatpush1.bf16.msra.mxu1 %v2712_v47  ;;  %1157 = vmatpush1.bf16.msra.mxu0 %v2716_v57  ;;  %v2761_v24 = vcombine.high %v160_v18, %v164_v19  ;;  %v168_v26 = vld [vmem:[#allocation5 + $0x300] sm:$0xff]  ;;  %v2760_v31 = vcombine.low %v160_v18, %v164_v19  ;;  %v174_v38 = vld [vmem:[#allocation5 + $0x330] sm:$0xff]  ;;  %v73_v57 = vld [vmem:[#allocation5 + $0x8] sm:$0xff] }
  0x51   :  { %932 = vmatprep.subr.bf16.mxu1 %v2721_v48  ;;  %1158 = vmatprep.subr.bf16.mxu0 %v2725_v60  ;;  %v172_v27 = vld [vmem:[#allocation5 + $0x320] sm:$0xff]  ;;  %v2773_v45 = vcombine.high %v170_v37, %v174_v38  ;;  %v178_v46 = vld [vmem:[#allocation5 + $0x350] sm:$0xff]  ;;  %v2772_v52 = vcombine.low %v170_v37, %v174_v38 }
  0x52   :  { %v2769_v32 = vcombine.high %v168_v26, %v172_v27  ;;  %v176_v34 = vld [vmem:[#allocation5 + $0x340] sm:$0xff]  ;;  %v2768_v39 = vcombine.low %v168_v26, %v172_v27  ;;  %v182_v47 = vld [vmem:[#allocation5 + $0x370] sm:$0xff]  ;;  %v117_v26 = vld [vmem:[#allocation5 + $0x168] sm:$0xff] }
  0x53   :  { %v180_v35 = vld [vmem:[#allocation5 + $0x360] sm:$0xff]  ;;  %v186_v53 = vld [vmem:[#allocation5 + $0x390] sm:$0xff]  ;;  %v2780_v60 = vcombine.low %v178_v46, %v182_v47 }
  0x54   :  { %933 = vmatpush1.bf16.msra.mxu1 %v2720_v55  ;;  %1159 = vmatpush1.bf16.msra.mxu0 %v2724_v1  ;;  %v2777_v40 = vcombine.high %v176_v34, %v180_v35  ;;  %v184_v43 = vld [vmem:[#allocation5 + $0x380] sm:$0xff]  ;;  %v2776_v48 = vcombine.low %v176_v34, %v180_v35  ;;  %v190_v54 = vld [vmem:[#allocation5 + $0x3b0] sm:$0xff]  ;;  %v2781_v55 = vcombine.high %v178_v46, %v182_v47  ;;  %v81_v1 = vld [vmem:[#allocation5 + $0x48] sm:$0xff] }
  0x55   :  { %934 = vmatprep.subr.bf16.mxu1 %v2729_v56  ;;  %1160 = vmatprep.subr.bf16.mxu0 %v2733_v4  ;;  %v188_v44 = vld [vmem:[#allocation5 + $0x3a0] sm:$0xff]  ;;  %v194_v61 = vld [vmem:[#allocation5 + $0x3d0] sm:$0xff]  ;;  %v2675_v4 = vcombine.high %v73_v57, %v77_v58  ;;  %v2788_v5 = vcombine.low %v186_v53, %v190_v54  ;;  %v2683_v11 = vcombine.high %v81_v1, %v85_v2  ;;  %v129_v35 = vld [vmem:[#allocation5 + $0x1c8] sm:$0xff] }
  0x56   :  { %v192_v49 = vld [vmem:[#allocation5 + $0x3c0] sm:$0xff]  ;;  %v2785_v51 = vcombine.high %v184_v43, %v188_v44  ;;  %v2784_v56 = vcombine.low %v184_v43, %v188_v44  ;;  %v198_v62 = vld [vmem:[#allocation5 + $0x3f0] sm:$0xff]  ;;  %v2682_v13 = vcombine.low %v81_v1, %v85_v2  ;;  %v141_v43 = vld [vmem:[#allocation5 + $0x228] sm:$0xff] }
  0x57   :  { %v196_v50 = vld [vmem:[#allocation5 + $0x3e0] sm:$0xff]  ;;  %v3547_v6 = vld [vmem:[#allocation2 + $0x14] ss:$8 sps:$4 sm:$0xff]   ;;  %v3567_v37 = vld [vmem:[#allocation2 + $0x30] ss:$8 sps:$4 sm:$0xff]  }
  0x58   :  { %935 = vmatpush1.bf16.msra.mxu1 %v2728_v63  ;;  %1161 = vmatpush1.bf16.msra.mxu0 %v2732_v9  ;;  %v2793_v59 = vcombine.high %v192_v49, %v196_v50  ;;  %v2789_v63 = vcombine.high %v186_v53, %v190_v54  ;;  %v3545_v3 = vld [vmem:[#allocation2] ss:$8 sps:$4 sm:$0xff]   ;;  %v3553_v18 = vld [vmem:[#allocation2 + $0x24] ss:$8 sps:$4 sm:$0xff]   ;;  %v3561_v29 = vld [vmem:[#allocation2 + $0x34] ss:$8 sps:$4 sm:$0xff]  }
  0x59   :  { %936 = vmatprep.subr.bf16.mxu1 %v2737_v0  ;;  %1162 = vmatprep.subr.bf16.mxu0 %v2741_v12  ;;  %v2792_v0 = vcombine.low %v192_v49, %v196_v50  ;;  %v89_v9 = vld [vmem:[#allocation5 + $0x88] sm:$0xff]  ;;  %v2796_v12 = vcombine.low %v194_v61, %v198_v62  ;;  %v3577_v50 = vld [vmem:[#allocation2 + $0x54] ss:$8 sps:$4 sm:$0xff]  }
  0x5a   :  { %v2690_v19 = vcombine.low %v89_v9, %v93_v10  ;;  %v3559_v27 = vld [vmem:[#allocation2 + $0x20] ss:$8 sps:$4 sm:$0xff]  }
  0x5b   :  { %v145_v46 = vld [vmem:[#allocation5 + $0x248] sm:$0xff] }
  0x5c   :  { %937 = vmatpush1.bf16.msra.mxu1 %v2736_v7  ;;  %1163 = vmatpush1.bf16.msra.mxu0 %v2740_v17  ;;  %v2797_v7 = vcombine.high %v194_v61, %v198_v62  ;;  %v2691_v17 = vcombine.high %v89_v9, %v93_v10  ;;  %v149_v47 = vld [vmem:[#allocation5 + $0x268] sm:$0xff] }
  0x5d   :  { %938 = vmatprep.subr.bf16.mxu1 %v2745_v8  ;;  %1164 = vmatprep.subr.bf16.mxu0 %v2749_v20  ;;  %v2674_v8 = vcombine.low %v73_v57, %v77_v58  ;;  %v105_v20 = vld [vmem:[#allocation5 + $0x108] sm:$0xff]  ;;  %v2746_v54 = vcombine.low %v145_v46, %v149_v47  ;;  %v3583_v58 = vld [vmem:[#allocation2 + $0x50] ss:$8 sps:$4 sm:$0xff]  }
  0x5e   :  { %v157_v53 = vld [vmem:[#allocation5 + $0x2a8] sm:$0xff] }
  0x5f   :  { %v165_v57 = vld [vmem:[#allocation5 + $0x2e8] sm:$0xff] }
  0x60   :  { %939 = vmatpush1.bf16.msra.mxu1 %v2744_v15  ;;  %1165 = vmatpush1.bf16.msra.mxu0 %v2748_v25  ;;  %v101_v15 = vld [vmem:[#allocation5 + $0xe8] sm:$0xff] }
  0x61   :  { %940 = vmatprep.subr.bf16.mxu1 %v2753_v16  ;;  %1166 = vmatprep.subr.bf16.mxu0 %v2757_v28  ;;  %v3551_v16 = vld [vmem:[#allocation2 + $0x10] ss:$8 sps:$4 sm:$0xff]   ;;  %v2699_v21 = vcombine.high %v97_v14, %v101_v15  ;;  %v113_v25 = vld [vmem:[#allocation5 + $0x148] sm:$0xff]  ;;  %v2706_v28 = vcombine.low %v105_v20, %v109_v22 }
  0x62   :  { %v2715_v30 = vcombine.high %v113_v25, %v117_v26  ;;  %v169_v62 = vld [vmem:[#allocation5 + $0x308] sm:$0xff] }
  0x63   :  { %v177_v2 = vld [vmem:[#allocation5 + $0x348] sm:$0xff] }
  0x64   :  { %941 = vmatpush1.bf16.msra.mxu1 %v2752_v23  ;;  %1167 = vmatpush1.bf16.msra.mxu0 %v2756_v33  ;;  %v2698_v23 = vcombine.low %v97_v14, %v101_v15  ;;  %v2714_v33 = vcombine.low %v113_v25, %v117_v26  ;;  %v185_v10 = vld [vmem:[#allocation5 + $0x388] sm:$0xff]  ;;  %v3029_v25 = vld [vmem:[#allocation7 + $0x14] ss:$8 sps:$4 sm:$0xff]  }
  0x65   :  { %942 = vmatprep.subr.bf16.mxu1 %v2761_v24  ;;  %1168 = vmatprep.subr.bf16.mxu0 %v2765_v36  ;;  %v2707_v24 = vcombine.high %v105_v20, %v109_v22  ;;  %v133_v36 = vld [vmem:[#allocation5 + $0x1e8] sm:$0xff]  ;;  %v75_v22 = vld [vmem:[#allocation5 + $0x18] sm:$0xff] }
  0x66   :  { %v2730_v44 = vcombine.low %v129_v35, %v133_v36  ;;  %v193_v14 = vld [vmem:[#allocation5 + $0x3c8] sm:$0xff] }
  0x67   :  { %v197_v15 = vld [vmem:[#allocation5 + $0x3e8] sm:$0xff] }
  0x68   :  { %943 = vmatpush1.bf16.msra.mxu1 %v2760_v31  ;;  %1169 = vmatpush1.bf16.msra.mxu0 %v2764_v42  ;;  %v121_v31 = vld [vmem:[#allocation5 + $0x188] sm:$0xff]  ;;  %v2795_v20 = vcombine.high %v193_v14, %v197_v15  ;;  %v2794_v26 = vcombine.low %v193_v14, %v197_v15  ;;  %v3045_v14 = vld [vmem:[#allocation7 + $0x70] ss:$8 sps:$4 sm:$0xff]  }
  0x69   :  { %944 = vmatprep.subr.bf16.mxu1 %v2769_v32  ;;  %1170 = vmatprep.subr.bf16.mxu0 %v2773_v45  ;;  %v125_v32 = vld [vmem:[#allocation5 + $0x1a8] sm:$0xff] }
  0x6a   :  { %v2723_v34 = vcombine.high %v121_v31, %v125_v32  ;;  %v2722_v38 = vcombine.low %v121_v31, %v125_v32  ;;  %v137_v42 = vld [vmem:[#allocation5 + $0x208] sm:$0xff]  ;;  %v83_v31 = vld [vmem:[#allocation5 + $0x58] sm:$0xff] }
  0x6b   :  { %v2739_v45 = vcombine.high %v137_v42, %v141_v43  ;;  %v2738_v49 = vcombine.low %v137_v42, %v141_v43  ;;  %v87_v32 = vld [vmem:[#allocation5 + $0x78] sm:$0xff] }
  0x6c   :  { %945 = vmatpush1.bf16.msra.mxu1 %v2768_v39  ;;  %1171 = vmatpush1.bf16.msra.mxu0 %v2772_v52  ;;  %v3569_v39 = vld [vmem:[#allocation2 + $0x44] ss:$8 sps:$4 sm:$0xff]   ;;  %v2686_v42 = vcombine.low %v83_v31, %v87_v32 }
  0x6d   :  { %946 = vmatprep.subr.bf16.mxu1 %v2777_v40  ;;  %1172 = vmatprep.subr.bf16.mxu0 %v2781_v55  ;;  %v2731_v40 = vcombine.high %v129_v35, %v133_v36  ;;  %v153_v52 = vld [vmem:[#allocation5 + $0x288] sm:$0xff]  ;;  %v2687_v35 = vcombine.high %v83_v31, %v87_v32  ;;  %v3051_v31 = vld [vmem:[#allocation7 + $0x90] ss:$8 sps:$4 sm:$0xff]  }
  0x6e   :  { %v2755_v55 = vcombine.high %v153_v52, %v157_v53  ;;  %v3030_v36 = vld [vmem:[#allocation7 + $0x20] ss:$8 sps:$4 sm:$0xff]  }
  0x70   :  { %947 = vmatpush1.bf16.msra.mxu1 %v2776_v48  ;;  %1173 = vmatpush1.bf16.msra.mxu0 %v2780_v60  ;;  %v3575_v48 = vld [vmem:[#allocation2 + $0x40] ss:$8 sps:$4 sm:$0xff]   ;;  %v3585_v60 = vld [vmem:[#allocation2 + $0x64] ss:$8 sps:$4 sm:$0xff]  }
  0x71   :  { %948 = vmatprep.subr.bf16.mxu1 %v2785_v51  ;;  %1174 = vmatprep.subr.bf16.mxu0 %v2789_v63  ;;  %v2747_v51 = vcombine.high %v145_v46, %v149_v47  ;;  %v173_v63 = vld [vmem:[#allocation5 + $0x328] sm:$0xff]  ;;  %v103_v46 = vld [vmem:[#allocation5 + $0xf8] sm:$0xff] }
  0x72   :  { %v2771_v1 = vcombine.high %v169_v62, %v173_v63  ;;  %v3038_v47 = vld [vmem:[#allocation7 + $0x44] ss:$8 sps:$4 sm:$0xff]  }
  0x74   :  { %949 = vmatpush1.bf16.msra.mxu1 %v2784_v56  ;;  %1175 = vmatpush1.bf16.msra.mxu0 %v2788_v5  ;;  %v161_v56 = vld [vmem:[#allocation5 + $0x2c8] sm:$0xff] }
  0x75   :  { %950 = vmatprep.subr.bf16.mxu1 %v2793_v59  ;;  %1176 = vmatprep.subr.bf16.mxu0 %v2797_v7  ;;  %v2754_v59 = vcombine.low %v153_v52, %v157_v53  ;;  %v2763_v61 = vcombine.high %v161_v56, %v165_v57  ;;  %v3591_v5 = vld [vmem:[#allocation2 + $0x60] ss:$8 sps:$4 sm:$0xff]   ;;  %v2770_v7 = vcombine.low %v169_v62, %v173_v63  ;;  %v107_v53 = vld [vmem:[#allocation5 + $0x118] sm:$0xff]  ;;  %v3044_v63 = vld [vmem:[#allocation7 + $0x64] ss:$8 sps:$4 sm:$0xff]  }
  0x76   :  { %v3036_v52 = vld [vmem:[#allocation7 + $0x40] ss:$8 sps:$4 sm:$0xff]   ;;  %v119_v62 = vld [vmem:[#allocation5 + $0x178] sm:$0xff] }
  0x78   :  { %951 = vmatpush1.bf16.msra.mxu1 %v2792_v0  ;;  %1177 = vmatpush1.bf16.msra.mxu0 %v2796_v12  ;;  %v2762_v0 = vcombine.low %v161_v56, %v165_v57 }
  0x79   :  { %1033 = vmatprep.subr.bf16.mxu1 %v2675_v4  ;;  %v181_v4 = vld [vmem:[#allocation5 + $0x368] sm:$0xff] }
  0x7a   :  { %v2779_v9 = vcombine.high %v177_v2, %v181_v4  ;;  %v2778_v12 = vcombine.low %v177_v2, %v181_v4  ;;  %v3042_v2 = vld [vmem:[#allocation7 + $0x60] ss:$8 sps:$4 sm:$0xff]   ;;  %v123_v4 = vld [vmem:[#allocation5 + $0x198] sm:$0xff] }
  0x7b   :  { %953 = vmatmul.mubr.bf16.vlgmr.msra.gmra.mrb[0].mxu1 %v3545_v3  ;;  %1179 = vmatmul.mubr.bf16.vlgmr.msra.gmra.mrb[0].mxu0 %v3545_v3 }
  0x7c   :  { %1034 = vmatpush1.bf16.msra.mxu1 %v2674_v8  ;;  %962 = vmatprep.mubr.bf16.mxu1 %v3547_v6  ;;  %v3593_v8 = vld [vmem:[#allocation2 + $0x74] ss:$8 sps:$4 sm:$0xff]  }
  0x7d   :  { %1035 = vmatprep.subr.bf16.mxu1 %v2683_v11  ;;  %1188 = vmatprep.mubr.bf16.mxu0 %v3547_v6  ;;  %v189_v11 = vld [vmem:[#allocation5 + $0x3a8] sm:$0xff] }
  0x80   :  { %1036 = vmatpush1.bf16.msra.mxu1 %v2682_v13  ;;  %v2787_v13 = vcombine.high %v185_v10, %v189_v11 }
  0x81   :  { %1037 = vmatprep.subr.bf16.mxu1 %v2691_v17  ;;  %v3599_v17 = vld [vmem:[#allocation2 + $0x70] ss:$8 sps:$4 sm:$0xff]  }
  0x83   :  { %963 = vmatmul.mubr.bf16.gmra.mrb[4].mxu1 %v3551_v16  ;;  %1189 = vmatmul.mubr.bf16.gmra.mrb[4].mxu0 %v3551_v16 }
  0x84   :  { %1038 = vmatpush1.bf16.msra.mxu1 %v2690_v19  ;;  %972 = vmatprep.mubr.bf16.mxu1 %v3553_v18  ;;  %v2786_v19 = vcombine.low %v185_v10, %v189_v11  ;;  %v3047_v11 = vld [vmem:[#allocation7 + $0x74] ss:$8 sps:$4 sm:$0xff]  }
  0x85   :  { %1039 = vmatprep.subr.bf16.mxu1 %v2699_v21  ;;  %1198 = vmatprep.mubr.bf16.mxu0 %v3553_v18  ;;  %v3026_v21 = vld [vmem:[#allocation7 + $0x4] ss:$8 sps:$4 sm:$0xff]  }
  0x86   :  { %2300 = vmatprep.subr.bf16.mxu0 %v3026_v21  ;;  %v139_v21 = vld [vmem:[#allocation5 + $0x218] sm:$0xff] }
  0x88   :  { %1040 = vmatpush1.bf16.msra.mxu1 %v2698_v23  ;;  %v79_v23 = vld [vmem:[#allocation5 + $0x38] sm:$0xff] }
  0x89   :  { %1041 = vmatprep.subr.bf16.mxu1 %v2707_v24  ;;  %v3024_v24 = vld [vmem:[#allocation7] ss:$8 sps:$4 sm:$0xff]  }
  0x8a   :  { %2301 = vmatpush1.bf16.msra.mxu0 %v3024_v24 }
  0x8b   :  { %973 = vmatmul.mubr.bf16.gmra.mrb[8].mxu1 %v3559_v27  ;;  %1199 = vmatmul.mubr.bf16.gmra.mrb[8].mxu0 %v3559_v27 }
  0x8c   :  { %1042 = vmatpush1.bf16.msra.mxu1 %v2706_v28  ;;  %982 = vmatprep.mubr.bf16.mxu1 %v3561_v29  ;;  %v2679_v28 = vcombine.high %v75_v22, %v79_v23 }
  0x8d   :  { %1043 = vmatprep.subr.bf16.mxu1 %v2715_v30  ;;  %1208 = vmatprep.mubr.bf16.mxu0 %v3561_v29  ;;  %v3027_v30 = vld [vmem:[#allocation7 + $0x10] ss:$8 sps:$4 sm:$0xff]  }
  0x8e   :  { %2302 = vmatprep.subr.bf16.mxu0 %v3029_v25 }
  0x8f   :  { %2303 = vmatpush1.bf16.msra.mxu0 %v3027_v30  ;;  %v151_v30 = vld [vmem:[#allocation5 + $0x278] sm:$0xff] }
  0x90   :  { %1044 = vmatpush1.bf16.msra.mxu1 %v2714_v33  ;;  %v3032_v33 = vld [vmem:[#allocation7 + $0x24] ss:$8 sps:$4 sm:$0xff]  }
  0x91   :  { %1045 = vmatprep.subr.bf16.mxu1 %v2723_v34  ;;  %v2678_v34 = vcombine.low %v75_v22, %v79_v23  ;;  %2304 = vmatprep.subr.bf16.mxu0 %v3032_v33  ;;  %v143_v22 = vld [vmem:[#allocation5 + $0x238] sm:$0xff]  ;;  %v3048_v23 = vld [vmem:[#allocation7 + $0x80] ss:$8 sps:$4 sm:$0xff]  }
  0x92   :  { %v2743_v25 = vcombine.high %v139_v21, %v143_v22  ;;  %v2742_v32 = vcombine.low %v139_v21, %v143_v22  ;;  %v3074_v21 = vld [vmem:[#allocation7 + $0x104] ss:$8 sps:$4 sm:$0xff]  }
  0x93   :  { %983 = vmatmul.mubr.bf16.gmra.mrb[12].mxu1 %v3567_v37  ;;  %1209 = vmatmul.mubr.bf16.gmra.mrb[12].mxu0 %v3567_v37 }
  0x94   :  { %1046 = vmatpush1.bf16.msra.mxu1 %v2722_v38  ;;  %992 = vmatprep.mubr.bf16.mxu1 %v3569_v39  ;;  %v91_v38 = vld [vmem:[#allocation5 + $0x98] sm:$0xff] }
  0x95   :  { %1047 = vmatprep.subr.bf16.mxu1 %v2731_v40  ;;  %1218 = vmatprep.mubr.bf16.mxu0 %v3569_v39  ;;  %v95_v40 = vld [vmem:[#allocation5 + $0xb8] sm:$0xff] }
  0x96   :  { %v2695_v43 = vcombine.high %v91_v38, %v95_v40  ;;  %2305 = vmatpush1.bf16.msra.mxu0 %v3030_v36  ;;  %v159_v36 = vld [vmem:[#allocation5 + $0x2b8] sm:$0xff] }
  0x98   :  { %1048 = vmatpush1.bf16.msra.mxu1 %v2730_v44  ;;  %v3033_v44 = vld [vmem:[#allocation7 + $0x30] ss:$8 sps:$4 sm:$0xff]  }
  0x99   :  { %1049 = vmatprep.subr.bf16.mxu1 %v2739_v45  ;;  %v99_v45 = vld [vmem:[#allocation5 + $0xd8] sm:$0xff] }
  0x9a   :  { %v2702_v56 = vcombine.low %v99_v45, %v103_v46 }
  0x9b   :  { %993 = vmatmul.mubr.bf16.gmra.mrb[16].mxu1 %v3575_v48  ;;  %1219 = vmatmul.mubr.bf16.gmra.mrb[16].mxu0 %v3575_v48 }
  0x9c   :  { %1050 = vmatpush1.bf16.msra.mxu1 %v2738_v49  ;;  %1002 = vmatprep.mubr.bf16.mxu1 %v3577_v50  ;;  %v2694_v49 = vcombine.low %v91_v38, %v95_v40  ;;  %v3054_v38 = vld [vmem:[#allocation7 + $0xa0] ss:$8 sps:$4 sm:$0xff]  }
  0x9d   :  { %1051 = vmatprep.subr.bf16.mxu1 %v2747_v51  ;;  %1228 = vmatprep.mubr.bf16.mxu0 %v3577_v50  ;;  %v2703_v51 = vcombine.high %v99_v45, %v103_v46  ;;  %v3057_v45 = vld [vmem:[#allocation7 + $0xb0] ss:$8 sps:$4 sm:$0xff]  }
  0xa0   :  { %1052 = vmatpush1.bf16.msra.mxu1 %v2746_v54  ;;  %v111_v54 = vld [vmem:[#allocation5 + $0x138] sm:$0xff] }
  0xa1   :  { %1053 = vmatprep.subr.bf16.mxu1 %v2755_v55  ;;  %v3041_v55 = vld [vmem:[#allocation7 + $0x54] ss:$8 sps:$4 sm:$0xff]   ;;  %v2711_v57 = vcombine.high %v107_v53, %v111_v54 }
  0xa3   :  { %1003 = vmatmul.mubr.bf16.gmra.mrb[20].mxu1 %v3583_v58  ;;  %1229 = vmatmul.mubr.bf16.gmra.mrb[20].mxu0 %v3583_v58 }
  0xa4   :  { %1054 = vmatpush1.bf16.msra.mxu1 %v2754_v59  ;;  %1012 = vmatprep.mubr.bf16.mxu1 %v3585_v60  ;;  %v3039_v59 = vld [vmem:[#allocation7 + $0x50] ss:$8 sps:$4 sm:$0xff]  }
  0xa5   :  { %1055 = vmatprep.subr.bf16.mxu1 %v2763_v61  ;;  %1238 = vmatprep.mubr.bf16.mxu0 %v3585_v60  ;;  %v115_v61 = vld [vmem:[#allocation5 + $0x158] sm:$0xff] }
  0xa8   :  { %1056 = vmatpush1.bf16.msra.mxu1 %v2762_v0  ;;  %v2710_v0 = vcombine.low %v107_v53, %v111_v54  ;;  %v3060_v53 = vld [vmem:[#allocation7 + $0xc0] ss:$8 sps:$4 sm:$0xff]  }
  0xa9   :  { %1057 = vmatprep.subr.bf16.mxu1 %v2771_v1  ;;  %v2719_v1 = vcombine.high %v115_v61, %v119_v62 }
  0xab   :  { %1013 = vmatmul.mubr.bf16.gmra.mrb[24].mxu1 %v3591_v5  ;;  %1239 = vmatmul.mubr.bf16.gmra.mrb[24].mxu0 %v3591_v5 }
  0xac   :  { %1058 = vmatpush1.bf16.msra.mxu1 %v2770_v7  ;;  %1022 = vmatprep.mubr.bf16.mxu1 %v3593_v8  ;;  %v127_v7 = vld [vmem:[#allocation5 + $0x1b8] sm:$0xff] }
  0xad   :  { %1059 = vmatprep.subr.bf16.mxu1 %v2779_v9  ;;  %1248 = vmatprep.mubr.bf16.mxu0 %v3593_v8  ;;  %v2718_v9 = vcombine.low %v115_v61, %v119_v62  ;;  %v2727_v10 = vcombine.high %v123_v4, %v127_v7  ;;  %v2726_v15 = vcombine.low %v123_v4, %v127_v7  ;;  %v3063_v61 = vld [vmem:[#allocation7 + $0xd0] ss:$8 sps:$4 sm:$0xff]   ;;  %v3066_v4 = vld [vmem:[#allocation7 + $0xe0] ss:$8 sps:$4 sm:$0xff]  }
  0xb0   :  { %1060 = vmatpush1.bf16.msra.mxu1 %v2778_v12  ;;  %v131_v12 = vld [vmem:[#allocation5 + $0x1d8] sm:$0xff] }
  0xb1   :  { %1061 = vmatprep.subr.bf16.mxu1 %v2787_v13  ;;  %v135_v13 = vld [vmem:[#allocation5 + $0x1f8] sm:$0xff] }
  0xb2   :  { %v2734_v24 = vcombine.low %v131_v12, %v135_v13 }
  0xb3   :  { %1023 = vmatmul.mubr.bf16.gmra.mrb[28].mxu1 %v3599_v17  ;;  %1249 = vmatmul.mubr.bf16.gmra.mrb[28].mxu0 %v3599_v17 }
  0xb4   :  { %1062 = vmatpush1.bf16.msra.mxu1 %v2786_v19  ;;  %1065 = vmatprep.mubr.bf16.mxu1 %v3541_v41  ;;  %v3035_v41 = vld [vmem:[#allocation7 + $0x34] ss:$8 sps:$4 sm:$0xff]   ;;  %v2735_v19 = vcombine.high %v131_v12, %v135_v13 }
  0xb5   :  { %1063 = vmatprep.subr.bf16.mxu1 %v2795_v20  ;;  %2306 = vmatprep.subr.bf16.mxu0 %v3035_v41  ;;  %v3050_v20 = vld [vmem:[#allocation7 + $0x84] ss:$8 sps:$4 sm:$0xff]   ;;  %v3071_v12 = vld [vmem:[#allocation7 + $0xf4] ss:$8 sps:$4 sm:$0xff]  }
  0xb6   :  { %2307 = vmatpush1.bf16.msra.mxu0 %v3033_v44  ;;  %v3059_v44 = vld [vmem:[#allocation7 + $0xb4] ss:$8 sps:$4 sm:$0xff]  }
  0xb7   :  { %2308 = vmatprep.subr.bf16.mxu0 %v3038_v47 }
  0xb8   :  { %1064 = vmatpush1.bf16.msra.mxu1 %v2794_v26  ;;  %v3053_v26 = vld [vmem:[#allocation7 + $0x94] ss:$8 sps:$4 sm:$0xff]  }
  0xb9   :  { %1259 = vmatprep.subr.bf16.mxu1 %v2679_v28  ;;  %v147_v28 = vld [vmem:[#allocation5 + $0x258] sm:$0xff] }
  0xba   :  { %2309 = vmatpush1.bf16.msra.mxu0 %v3036_v52  ;;  %v2751_v33 = vcombine.high %v147_v28, %v151_v30  ;;  %v2750_v40 = vcombine.low %v147_v28, %v151_v30  ;;  %v3062_v52 = vld [vmem:[#allocation7 + $0xc4] ss:$8 sps:$4 sm:$0xff]  }
  0xbb   :  { %1066 = vmatmul.mubr.bf16.vlgmr.msra.gmra.mrb[32].mxu1 %v3545_v3  ;;  %2310 = vmatprep.subr.bf16.mxu0 %v3041_v55 }
  0xbc   :  { %1260 = vmatpush1.bf16.msra.mxu1 %v2678_v34  ;;  %1075 = vmatprep.mubr.bf16.mxu1 %v3547_v6  ;;  %v3056_v34 = vld [vmem:[#allocation7 + $0xa4] ss:$8 sps:$4 sm:$0xff]  }
  0xbd   :  { %1261 = vmatprep.subr.bf16.mxu1 %v2687_v35  ;;  %v155_v35 = vld [vmem:[#allocation5 + $0x298] sm:$0xff] }
  0xbe   :  { %2311 = vmatpush1.bf16.msra.mxu0 %v3039_v59  ;;  %v2759_v41 = vcombine.high %v155_v35, %v159_v36  ;;  %v2758_v46 = vcombine.low %v155_v35, %v159_v36  ;;  %v3065_v59 = vld [vmem:[#allocation7 + $0xd4] ss:$8 sps:$4 sm:$0xff]  }
  0xbf   :  { %2312 = vmatprep.subr.bf16.mxu0 %v3044_v63 }
  0xc0   :  { %1262 = vmatpush1.bf16.msra.mxu1 %v2686_v42  ;;  %v163_v42 = vld [vmem:[#allocation5 + $0x2d8] sm:$0xff] }
  0xc1   :  { %1263 = vmatprep.subr.bf16.mxu1 %v2695_v43  ;;  %v167_v43 = vld [vmem:[#allocation5 + $0x2f8] sm:$0xff] }
  0xc2   :  { %2313 = vmatpush1.bf16.msra.mxu0 %v3042_v2  ;;  %v2767_v47 = vcombine.high %v163_v42, %v167_v43  ;;  %v2766_v54 = vcombine.low %v163_v42, %v167_v43  ;;  %v3068_v2 = vld [vmem:[#allocation7 + $0xe4] ss:$8 sps:$4 sm:$0xff]  }
  0xc3   :  { %1076 = vmatmul.mubr.bf16.gmra.mrb[36].mxu1 %v3551_v16  ;;  %2314 = vmatprep.subr.bf16.mxu0 %v3047_v11  ;;  %v199_v11 = vld [vmem:[#allocation5 + $0x3f8] sm:$0xff] }
  0xc4   :  { %1264 = vmatpush1.bf16.msra.mxu1 %v2694_v49  ;;  %1085 = vmatprep.mubr.bf16.mxu1 %v3553_v18  ;;  %v171_v49 = vld [vmem:[#allocation5 + $0x318] sm:$0xff] }
  0xc5   :  { %1265 = vmatprep.subr.bf16.mxu1 %v2703_v51  ;;  %v175_v51 = vld [vmem:[#allocation5 + $0x338] sm:$0xff] }
  0xc6   :  { %2315 = vmatpush1.bf16.msra.mxu0 %v3045_v14  ;;  %v2775_v55 = vcombine.high %v171_v49, %v175_v51  ;;  %v2774_v62 = vcombine.low %v171_v49, %v175_v51  ;;  %v3069_v14 = vld [vmem:[#allocation7 + $0xf0] ss:$8 sps:$4 sm:$0xff]  }
  0xc7   :  { %2316 = vmatprep.subr.bf16.mxu0 %v3050_v20  ;;  %v3376_v20 = vld [vmem:[#allocation2 + $0x4] ss:$8 sps:$4 sm:$0xff]  }
  0xc8   :  { %1266 = vmatpush1.bf16.msra.mxu1 %v2702_v56  ;;  %v179_v56 = vld [vmem:[#allocation5 + $0x358] sm:$0xff] }
  0xc9   :  { %1267 = vmatprep.subr.bf16.mxu1 %v2711_v57  ;;  %v183_v57 = vld [vmem:[#allocation5 + $0x378] sm:$0xff] }
  0xca   :  { %2317 = vmatpush1.bf16.msra.mxu0 %v3048_v23  ;;  %v2783_v63 = vcombine.high %v179_v56, %v183_v57  ;;  %v2782_v7 = vcombine.low %v179_v56, %v183_v57 }
  0xcb   :  { %1086 = vmatmul.mubr.bf16.gmra.mrb[40].mxu1 %v3559_v27  ;;  %2318 = vmatprep.subr.bf16.mxu0 %v3053_v26 }
  0xcc   :  { %1268 = vmatpush1.bf16.msra.mxu1 %v2710_v0  ;;  %1095 = vmatprep.mubr.bf16.mxu1 %v3561_v29  ;;  %v187_v0 = vld [vmem:[#allocation5 + $0x398] sm:$0xff] }
  0xcd   :  { %1269 = vmatprep.subr.bf16.mxu1 %v2719_v1  ;;  %v191_v1 = vld [vmem:[#allocation5 + $0x3b8] sm:$0xff] }
  0xce   :  { %2319 = vmatpush1.bf16.msra.mxu0 %v3051_v31  ;;  %v2790_v13 = vcombine.low %v187_v0, %v191_v1 }
  0xcf   :  { %2320 = vmatprep.subr.bf16.mxu0 %v3056_v34 }
  0xd0   :  { %1270 = vmatpush1.bf16.msra.mxu1 %v2718_v9  ;;  %v2791_v9 = vcombine.high %v187_v0, %v191_v1 }
  0xd1   :  { %1271 = vmatprep.subr.bf16.mxu1 %v2727_v10  ;;  %v195_v10 = vld [vmem:[#allocation5 + $0x3d8] sm:$0xff] }
  0xd2   :  { %2321 = vmatpush1.bf16.msra.mxu0 %v3054_v38 }
  0xd3   :  { %1096 = vmatmul.mubr.bf16.gmra.mrb[44].mxu1 %v3567_v37  ;;  %2322 = vmatprep.subr.bf16.mxu0 %v3059_v44 }
  0xd4   :  { %1272 = vmatpush1.bf16.msra.mxu1 %v2726_v15  ;;  %1105 = vmatprep.mubr.bf16.mxu1 %v3569_v39  ;;  %v2799_v15 = vcombine.high %v195_v10, %v199_v11 }
  0xd5   :  { %1273 = vmatprep.subr.bf16.mxu1 %v2735_v19  ;;  %v2798_v19 = vcombine.low %v195_v10, %v199_v11 }
  0xd6   :  { %2323 = vmatpush1.bf16.msra.mxu0 %v3057_v45 }
  0xd7   :  { %2324 = vmatprep.subr.bf16.mxu0 %v3062_v52 }
  0xd8   :  { %1274 = vmatpush1.bf16.msra.mxu1 %v2734_v24 }
  0xd9   :  { %1275 = vmatprep.subr.bf16.mxu1 %v2743_v25 }
  0xda   :  { %2325 = vmatpush1.bf16.msra.mxu0 %v3060_v53 }
  0xdb   :  { %1106 = vmatmul.mubr.bf16.gmra.mrb[48].mxu1 %v3575_v48  ;;  %2326 = vmatprep.subr.bf16.mxu0 %v3065_v59 }
  0xdc   :  { %1276 = vmatpush1.bf16.msra.mxu1 %v2742_v32  ;;  %1115 = vmatprep.mubr.bf16.mxu1 %v3577_v50 }
  0xdd   :  { %1277 = vmatprep.subr.bf16.mxu1 %v2751_v33 }
  0xde   :  { %2327 = vmatpush1.bf16.msra.mxu0 %v3063_v61 }
  0xdf   :  { %2328 = vmatprep.subr.bf16.mxu0 %v3068_v2 }
  0xe0   :  { %1278 = vmatpush1.bf16.msra.mxu1 %v2750_v40 }
  0xe1   :  { %1279 = vmatprep.subr.bf16.mxu1 %v2759_v41 }
  0xe2   :  { %2329 = vmatpush1.bf16.msra.mxu0 %v3066_v4 }
  0xe3   :  { %1116 = vmatmul.mubr.bf16.gmra.mrb[52].mxu1 %v3583_v58  ;;  %2330 = vmatprep.subr.bf16.mxu0 %v3071_v12 }
  0xe4   :  { %1280 = vmatpush1.bf16.msra.mxu1 %v2758_v46  ;;  %1125 = vmatprep.mubr.bf16.mxu1 %v3585_v60 }
  0xe5   :  { %1281 = vmatprep.subr.bf16.mxu1 %v2767_v47 }
  0xe6   :  { %2331 = vmatpush1.bf16.msra.mxu0 %v3069_v14 }
  0xe7   :  { %2413 = vmatprep.subr.bf16.mxu0 %v3074_v21 }
  0xe8   :  { %1282 = vmatpush1.bf16.msra.mxu1 %v2766_v54 }
  0xe9   :  { %1283 = vmatprep.subr.bf16.mxu1 %v2775_v55 }
  0xeb   :  { %1126 = vmatmul.mubr.bf16.gmra.mrb[56].mxu1 %v3591_v5 }
  0xec   :  { %1284 = vmatpush1.bf16.msra.mxu1 %v2774_v62  ;;  %1135 = vmatprep.mubr.bf16.mxu1 %v3593_v8 }
  0xed   :  { %1285 = vmatprep.subr.bf16.mxu1 %v2783_v63 }
  0xf0   :  { %1286 = vmatpush1.bf16.msra.mxu1 %v2782_v7 }
  0xf1   :  { %1287 = vmatprep.subr.bf16.mxu1 %v2791_v9 }
  0xf3   :  { %1136 = vmatmul.mubr.bf16.gmra.mrb[60].mxu1 %v3599_v17 }
  0xf4   :  { %1288 = vmatpush1.bf16.msra.mxu1 %v2790_v13  ;;  %1291 = vmatprep.mubr.bf16.mxu1 %v3376_v20 }
  0xf5   :  { %1289 = vmatprep.subr.bf16.mxu1 %v2799_v15 }
  0xf8   :  { %1290 = vmatpush1.bf16.msra.mxu1 %v2798_v19 }
  0xfb   :  { %1292 = vmatmul.mubr.bf16.vlgmr.msra.gmra.mrb[64].mxu1 %v3545_v3 }
  0xfc   :  { %1301 = vmatprep.mubr.bf16.mxu1 %v3547_v6 }
 0x103   :  { %1302 = vmatmul.mubr.bf16.gmra.mrb[68].mxu1 %v3551_v16 }
 0x104   :  { %1311 = vmatprep.mubr.bf16.mxu1 %v3553_v18 }
 0x10b   :  { %1312 = vmatmul.mubr.bf16.gmra.mrb[72].mxu1 %v3559_v27 }
 0x10c   :  { %1321 = vmatprep.mubr.bf16.mxu1 %v3561_v29 }
 0x113   :  { %1322 = vmatmul.mubr.bf16.gmra.mrb[76].mxu1 %v3567_v37 }
 0x114   :  { %1331 = vmatprep.mubr.bf16.mxu1 %v3569_v39 }
 0x11b   :  { %1332 = vmatmul.mubr.bf16.gmra.mrb[80].mxu1 %v3575_v48 }
 0x11c   :  { %1341 = vmatprep.mubr.bf16.mxu1 %v3577_v50 }
 0x123   :  { %1342 = vmatmul.mubr.bf16.gmra.mrb[84].mxu1 %v3583_v58 }
 0x124   :  { %1351 = vmatprep.mubr.bf16.mxu1 %v3585_v60 }
 0x12b   :  { %1352 = vmatmul.mubr.bf16.gmra.mrb[88].mxu1 %v3591_v5 }
 0x12c   :  { %1361 = vmatprep.mubr.bf16.mxu1 %v3593_v8 }
 0x133   :  { %1362 = vmatmul.mubr.bf16.gmra.mrb[92].mxu1 %v3599_v17 }
 0x14e   :  { %v3636_v3 = vpop.f32.mrb[0].mxu1  ;;  %v3648_v48 = vpop.f32.mrb[0].mxu0 }
 0x14f   :  { %v2800_v6 = vmul.f32 -1.442695, %v3636_v3  ;;  %v3639_v16 = vpop.f32.mrb[1].mxu1  ;;  %v3650_v50 = vpop.f32.mrb[1].mxu0 }
 0x150   :  { %v2801_v18 = vmul.f32 -1.442695, %v3639_v16  ;;  %v3642_v27 = vpop.f32.mrb[2].mxu1  ;;  %v3652_v58 = vpop.f32.mrb[2].mxu0 }
 0x151   :  { %3120 = vpow2.f32 %v2800_v6  ;;  %v2804_v29 = vmul.f32 -1.442695, %v3642_v27  ;;  %v3645_v37 = vpop.f32.mrb[3].mxu1  ;;  %v3656_v5 = vpop.f32.mrb[3].mxu0 }
 0x152   :  { %3122 = vpow2.f32 %v2801_v18  ;;  %v2805_v39 = vmul.f32 -1.442695, %v3645_v37 }
 0x153   :  { %3124 = vpow2.f32 %v2804_v29 }
 0x154   :  { %3126 = vpow2.f32 %v2805_v39 }
 0x156   :  { %v3654_v60 = vpop.f32.mrb[4].mxu1  ;;  %v3668_v30 = vpop.f32.mrb[4].mxu0 }
 0x157   :  { %v2808_v8 = vmul.f32 -1.442695, %v3654_v60  ;;  %v3659_v17 = vpop.f32.mrb[5].mxu1  ;;  %v3670_v33 = vpop.f32.mrb[5].mxu0 }
 0x158   :  { %v2809_v22 = vmul.f32 -1.442695, %v3659_v17  ;;  %v3662_v23 = vpop.f32.mrb[6].mxu1  ;;  %v3672_v36 = vpop.f32.mrb[6].mxu0 }
 0x159   :  { %3128 = vpow2.f32 %v2808_v8  ;;  %v2812_v24 = vmul.f32 -1.442695, %v3662_v23  ;;  %v3665_v25 = vpop.f32.mrb[7].mxu1  ;;  %v3676_v42 = vpop.f32.mrb[7].mxu0 }
 0x15a   :  { %3130 = vpow2.f32 %v2809_v22  ;;  %v2813_v26 = vmul.f32 -1.442695, %v3665_v25 }
 0x15b   :  { %v3121_v28 = vpop.eup %3120  ;;  %3132 = vpow2.f32 %v2812_v24 }
 0x15c   :  { %v3123_v31 = vpop.eup %3122  ;;  %v1564_v32 = vadd.f32 1.0, %v3121_v28  ;;  %3134 = vpow2.f32 %v2813_v26 }
 0x15d   :  { %v3125_v34 = vpop.eup %3124  ;;  %v1565_v35 = vadd.f32 1.0, %v3123_v31 }
 0x15e   :  { %v3127_v38 = vpop.eup %3126  ;;  %3136 = vrcp.f32 %v1564_v32  ;;  %v1568_v40 = vadd.f32 1.0, %v3125_v34  ;;  %v3674_v41 = vpop.f32.mrb[8].mxu1 }
 0x15f   :  { %3138 = vrcp.f32 %v1565_v35  ;;  %v1569_v43 = vadd.f32 1.0, %v3127_v38  ;;  %v2816_v44 = vmul.f32 -1.442695, %v3674_v41  ;;  %v3679_v45 = vpop.f32.mrb[9].mxu1  ;;  %v3688_v54 = vpop.f32.mrb[8].mxu0 }
 0x160   :  { %3140 = vrcp.f32 %v1568_v40  ;;  %v2817_v46 = vmul.f32 -1.442695, %v3679_v45  ;;  %v3682_v47 = vpop.f32.mrb[10].mxu1  ;;  %v3690_v57 = vpop.f32.mrb[9].mxu0 }
 0x161   :  { %3142 = vrcp.f32 %v1569_v43  ;;  %v2820_v49 = vmul.f32 -1.442695, %v3682_v47  ;;  %v3685_v51 = vpop.f32.mrb[11].mxu1  ;;  %v3692_v62 = vpop.f32.mrb[10].mxu0 }
 0x162   :  { %3144 = vpow2.f32 %v2816_v44  ;;  %v2821_v52 = vmul.f32 -1.442695, %v3685_v51  ;;  %v3696_v2 = vpop.f32.mrb[11].mxu0 }
 0x163   :  { %v3129_v53 = vpop.eup %3128  ;;  %3146 = vpow2.f32 %v2817_v46 }
 0x164   :  { %v3131_v55 = vpop.eup %3130  ;;  %v1572_v56 = vadd.f32 1.0, %v3129_v53  ;;  %3148 = vpow2.f32 %v2820_v49 }
 0x165   :  { %v3133_v59 = vpop.eup %3132  ;;  %v1573_v61 = vadd.f32 1.0, %v3131_v55  ;;  %3150 = vpow2.f32 %v2821_v52 }
 0x166   :  { %v3135_v63 = vpop.eup %3134  ;;  %3152 = vrcp.f32 %v1572_v56  ;;  %v1576_v0 = vadd.f32 1.0, %v3133_v59  ;;  %v3694_v1 = vpop.f32.mrb[12].mxu1 }
 0x167   :  { %3154 = vrcp.f32 %v1573_v61  ;;  %v1577_v4 = vadd.f32 1.0, %v3135_v63  ;;  %v2824_v7 = vmul.f32 -1.442695, %v3694_v1  ;;  %v3699_v9 = vpop.f32.mrb[13].mxu1  ;;  %v3712_v8 = vpop.f32.mrb[12].mxu0 }
 0x168   :  { %v3137_v10 = vpop.eup %3136  ;;  %3156 = vrcp.f32 %v1576_v0  ;;  %v2825_v11 = vmul.f32 -1.442695, %v3699_v9  ;;  %v3702_v12 = vpop.f32.mrb[14].mxu1  ;;  %v3077_v63 = vld [vmem:[#allocation7 + $0x114] ss:$8 sps:$4 sm:$0xff]  }
 0x169   :  { %v3139_v13 = vpop.eup %3138  ;;  %v1756_v14 = vmul.f32 %v3137_v10, %v3636_v3  ;;  %3158 = vrcp.f32 %v1577_v4  ;;  %v2828_v15 = vmul.f32 -1.442695, %v3702_v12  ;;  %v3706_v19 = vpop.f32.mrb[15].mxu1 }
 0x16a   :  { %v3141_v20 = vpop.eup %3140  ;;  %v1757_v21 = vmul.f32 %v3139_v13, %v3639_v16  ;;  %3160 = vpow2.f32 %v2824_v7  ;;  %v2829_v6 = vmul.f32 -1.442695, %v3706_v19  ;;  %v3716_v26 = vpop.f32.mrb[13].mxu0 }
 0x16b   :  { %v3143_v18 = vpop.eup %3142  ;;  %v1760_v29 = vmul.f32 %v3141_v20, %v3642_v27  ;;  %3162 = vpow2.f32 %v2825_v11  ;;  %v1820_v39 = vmul.f32 %v1756_v14, %v3648_v48  ;;  %v3719_v32 = vpop.f32.mrb[14].mxu0 }
 0x16c   :  { %v3145_v3 = vpop.eup %3144  ;;  %v1761_v22 = vmul.f32 %v3143_v18, %v3645_v37  ;;  %3164 = vpow2.f32 %v2828_v15  ;;  %v1821_v24 = vmul.f32 %v1757_v21, %v3650_v50  ;;  %v3724_v38 = vpop.f32.mrb[15].mxu0  ;;  %v3075_v21 = vld [vmem:[#allocation7 + $0x110] ss:$8 sps:$4 sm:$0xff]  }
 0x16d   :  { %v3147_v16 = vpop.eup %3146  ;;  %v1580_v28 = vadd.f32 1.0, %v3145_v3  ;;  %3166 = vpow2.f32 %v2829_v6  ;;  %v1824_v31 = vmul.f32 %v1760_v29, %v3652_v58 }
 0x16e   :  { %v3149_v27 = vpop.eup %3148  ;;  %v1581_v34 = vadd.f32 1.0, %v3147_v16  ;;  %v1825_v48 = vmul.f32 %v1761_v22, %v3656_v5  ;;  %v3722_v35 = vpop.f32.mrb[16].mxu1  ;;  %v3072_v5 = vld [vmem:[#allocation7 + $0x100] ss:$8 sps:$4 sm:$0xff]  }
 0x16f   :  { %v3151_v37 = vpop.eup %3150  ;;  %3168 = vrcp.f32 %v1580_v28  ;;  %v1584_v50 = vadd.f32 1.0, %v3149_v27  ;;  %v1884_v40 = vpack.c.bf16 %v1824_v31, %v1820_v39  ;;  %v2832_v43 = vmul.f32 -1.442695, %v3722_v35  ;;  %v3727_v44 = vpop.f32.mrb[17].mxu1 }
 0x170   :  { %v3153_v46 = vpop.eup %3152  ;;  %3170 = vrcp.f32 %v1581_v34  ;;  %v1585_v58 = vadd.f32 1.0, %v3151_v37  ;;  %v1885_v49 = vpack.c.bf16 %v1825_v48, %v1821_v24  ;;  %v2833_v52 = vmul.f32 -1.442695, %v3727_v44  ;;  %v3730_v53 = vpop.f32.mrb[18].mxu1 }
 0x171   :  { %v3155_v55 = vpop.eup %3154  ;;  %v1764_v56 = vmul.f32 %v3153_v46, %v3654_v60  ;;  %3172 = vrcp.f32 %v1584_v50  ;;  %v2836_v59 = vmul.f32 -1.442695, %v3730_v53  ;;  %v3734_v61 = vpop.f32.mrb[19].mxu1  ;;  %v3083_v46 = vld [vmem:[#allocation7 + $0x134] ss:$8 sps:$4 sm:$0xff]  }
 0x172   :  { %v3157_v0 = vpop.eup %3156  ;;  %v1765_v4 = vmul.f32 %v3155_v55, %v3659_v17  ;;  %3174 = vrcp.f32 %v1585_v58  ;;  %v2837_v7 = vmul.f32 -1.442695, %v3734_v61  ;;  %2332 = vmatprep.mubr.bf16.mxu0 %v1885_v49  ;;  %v3740_v60 = vpop.f32.mrb[16].mxu0 }
 0x173   :  { %v3159_v10 = vpop.eup %3158  ;;  %v1768_v11 = vmul.f32 %v3157_v0, %v3662_v23  ;;  %3176 = vpow2.f32 %v2832_v43  ;;  %v1828_v13 = vmul.f32 %v1764_v56, %v3668_v30  ;;  %2333 = vmatmul.mubr.bf16.vlgmr.msra.gmra.mrb[32].mxu0 %v1884_v40  ;;  %v3744_v17 = vpop.f32.mrb[17].mxu0  ;;  %v3080_v30 = vld [vmem:[#allocation7 + $0x124] ss:$8 sps:$4 sm:$0xff]  }
 0x174   :  { %v3161_v14 = vpop.eup %3160  ;;  %v1769_v15 = vmul.f32 %v3159_v10, %v3665_v25  ;;  %3178 = vpow2.f32 %v2833_v52  ;;  %v1829_v20 = vmul.f32 %v1765_v4, %v3670_v33  ;;  %2414 = vmatpush1.bf16.msra.mxu0 %v3072_v5  ;;  %v3747_v29 = vpop.f32.mrb[18].mxu0 }
 0x175   :  { %v3163_v6 = vpop.eup %3162  ;;  %v1588_v18 = vadd.f32 1.0, %v3161_v14  ;;  %3180 = vpow2.f32 %v2836_v59  ;;  %v1832_v23 = vmul.f32 %v1768_v11, %v3672_v36  ;;  %2415 = vmatprep.subr.bf16.mxu0 %v3077_v63  ;;  %v3752_v33 = vpop.f32.mrb[19].mxu0 }
 0x176   :  { %v3165_v39 = vpop.eup %3164  ;;  %v1589_v3 = vadd.f32 1.0, %v3163_v6  ;;  %3182 = vpow2.f32 %v2837_v7  ;;  %v1833_v25 = vmul.f32 %v1769_v15, %v3676_v42  ;;  %v3750_v22 = vpop.f32.mrb[20].mxu1  ;;  %v3078_v42 = vld [vmem:[#allocation7 + $0x120] ss:$8 sps:$4 sm:$0xff]  }
 0x177   :  { %v3167_v24 = vpop.eup %3166  ;;  %3184 = vrcp.f32 %v1588_v18  ;;  %v1592_v16 = vadd.f32 1.0, %v3165_v39  ;;  %v1888_v28 = vpack.c.bf16 %v1832_v23, %v1828_v13  ;;  %v2840_v31 = vmul.f32 -1.442695, %v3750_v22  ;;  %v3755_v36 = vpop.f32.mrb[21].mxu1  ;;  %v3086_v13 = vld [vmem:[#allocation7 + $0x144] ss:$8 sps:$4 sm:$0xff]  }
 0x178   :  { %3186 = vrcp.f32 %v1589_v3  ;;  %v1593_v27 = vadd.f32 1.0, %v3167_v24  ;;  %v1889_v34 = vpack.c.bf16 %v1833_v25, %v1829_v20  ;;  %v2841_v48 = vmul.f32 -1.442695, %v3755_v36  ;;  %v3758_v37 = vpop.f32.mrb[22].mxu1  ;;  %2416 = vmatpush1.bf16.msra.mxu0 %v3075_v21  ;;  %v3766_v56 = vpop.f32.mrb[20].mxu0 }
 0x179   :  { %v3169_v50 = vpop.eup %3168  ;;  %3188 = vrcp.f32 %v1592_v16  ;;  %v2844_v40 = vmul.f32 -1.442695, %v3758_v37  ;;  %v3761_v43 = vpop.f32.mrb[23].mxu1  ;;  %2417 = vmatprep.subr.bf16.mxu0 %v3080_v30 }
 0x17a   :  { %v3171_v58 = vpop.eup %3170  ;;  %v1772_v49 = vmul.f32 %v3169_v50, %v3674_v41  ;;  %3190 = vrcp.f32 %v1593_v27  ;;  %v2845_v52 = vmul.f32 -1.442695, %v3761_v43  ;;  %2342 = vmatprep.mubr.bf16.mxu0 %v1889_v34  ;;  %v3770_v4 = vpop.f32.mrb[21].mxu0  ;;  %v3081_v41 = vld [vmem:[#allocation7 + $0x130] ss:$8 sps:$4 sm:$0xff]  }
 0x17b   :  { %v3173_v5 = vpop.eup %3172  ;;  %v1773_v55 = vmul.f32 %v3171_v58, %v3679_v45  ;;  %3192 = vpow2.f32 %v2840_v31  ;;  %2343 = vmatmul.mubr.bf16.gmra.mrb[36].mxu0 %v1888_v28  ;;  %v3774_v11 = vpop.f32.mrb[22].mxu0 }
 0x17c   :  { %v3175_v59 = vpop.eup %3174  ;;  %v1776_v63 = vmul.f32 %v3173_v5, %v3682_v47  ;;  %3194 = vpow2.f32 %v2841_v48  ;;  %v1836_v0 = vmul.f32 %v1772_v49, %v3688_v54  ;;  %2418 = vmatpush1.bf16.msra.mxu0 %v3078_v42  ;;  %v3779_v20 = vpop.f32.mrb[23].mxu0  ;;  %v3089_v48 = vld [vmem:[#allocation7 + $0x154] ss:$8 sps:$4 sm:$0xff]  }
 0x17d   :  { %v3177_v7 = vpop.eup %3176  ;;  %v1777_v10 = vmul.f32 %v3175_v59, %v3685_v51  ;;  %3196 = vpow2.f32 %v2844_v40  ;;  %v1837_v45 = vmul.f32 %v1773_v55, %v3690_v57  ;;  %2419 = vmatprep.subr.bf16.mxu0 %v3083_v46 }
 0x17e   :  { %v3179_v14 = vpop.eup %3178  ;;  %v1596_v15 = vadd.f32 1.0, %v3177_v7  ;;  %3198 = vpow2.f32 %v2845_v52  ;;  %v1840_v47 = vmul.f32 %v1776_v63, %v3692_v62  ;;  %v3777_v54 = vpop.f32.mrb[24].mxu1  ;;  %v3087_v63 = vld [vmem:[#allocation7 + $0x150] ss:$8 sps:$4 sm:$0xff]  }
 0x17f   :  { %v3181_v21 = vpop.eup %3180  ;;  %v1597_v6 = vadd.f32 1.0, %v3179_v14  ;;  %v1841_v51 = vmul.f32 %v1777_v10, %v3696_v2  ;;  %v3782_v18 = vpop.f32.mrb[25].mxu1  ;;  %v2848_v39 = vmul.f32 -1.442695, %v3777_v54  ;;  %v3084_v2 = vld [vmem:[#allocation7 + $0x140] ss:$8 sps:$4 sm:$0xff]  }
 0x180   :  { %v3183_v57 = vpop.eup %3182  ;;  %3200 = vrcp.f32 %v1596_v15  ;;  %v1600_v23 = vadd.f32 1.0, %v3181_v21  ;;  %v1892_v30 = vpack.c.bf16 %v1840_v47, %v1836_v0  ;;  %v3785_v3 = vpop.f32.mrb[26].mxu1  ;;  %2420 = vmatpush1.bf16.msra.mxu0 %v3081_v41  ;;  %v2849_v16 = vmul.f32 -1.442695, %v3782_v18  ;;  %v3092_v10 = vld [vmem:[#allocation7 + $0x164] ss:$8 sps:$4 sm:$0xff]  }
 0x181   :  { %v3185_v62 = vpop.eup %3184  ;;  %3202 = vrcp.f32 %v1597_v6  ;;  %v1601_v25 = vadd.f32 1.0, %v3183_v57  ;;  %v1893_v24 = vpack.c.bf16 %v1841_v51, %v1837_v45  ;;  %v3788_v28 = vpop.f32.mrb[27].mxu1  ;;  %2421 = vmatprep.subr.bf16.mxu0 %v3086_v13  ;;  %v2852_v34 = vmul.f32 -1.442695, %v3785_v3 }
 0x182   :  { %v3187_v31 = vpop.eup %3186  ;;  %v1780_v27 = vmul.f32 %v3185_v62, %v3694_v1  ;;  %3204 = vrcp.f32 %v1600_v23  ;;  %v2853_v40 = vmul.f32 -1.442695, %v3788_v28  ;;  %v3794_v46 = vpop.f32.mrb[24].mxu0  ;;  %v3095_v62 = vld [vmem:[#allocation7 + $0x174] ss:$8 sps:$4 sm:$0xff]  }
 0x183   :  { %v3189_v42 = vpop.eup %3188  ;;  %v1781_v50 = vmul.f32 %v3187_v31, %v3699_v9  ;;  %3206 = vrcp.f32 %v1601_v25  ;;  %2352 = vmatprep.mubr.bf16.mxu0 %v1893_v24  ;;  %v3798_v1 = vpop.f32.mrb[25].mxu0 }
 0x184   :  { %v3191_v58 = vpop.eup %3190  ;;  %v1784_v49 = vmul.f32 %v3189_v42, %v3702_v12  ;;  %3208 = vpow2.f32 %v2848_v39  ;;  %v1844_v52 = vmul.f32 %v1780_v27, %v3712_v8  ;;  %2353 = vmatmul.mubr.bf16.gmra.mrb[40].mxu0 %v1892_v30  ;;  %v3802_v59 = vpop.f32.mrb[26].mxu0  ;;  %v3090_v30 = vld [vmem:[#allocation7 + $0x160] ss:$8 sps:$4 sm:$0xff]  }
 0x185   :  { %v3193_v5 = vpop.eup %3192  ;;  %v1785_v55 = vmul.f32 %v3191_v58, %v3706_v19  ;;  %3210 = vpow2.f32 %v2849_v16  ;;  %v1845_v9 = vmul.f32 %v1781_v50, %v3716_v26  ;;  %2422 = vmatpush1.bf16.msra.mxu0 %v3084_v2  ;;  %v3807_v8 = vpop.f32.mrb[27].mxu0 }
 0x186   :  { %v3195_v0 = vpop.eup %3194  ;;  %v1604_v41 = vadd.f32 1.0, %v3193_v5  ;;  %3212 = vpow2.f32 %v2852_v34  ;;  %v1848_v12 = vmul.f32 %v1784_v49, %v3719_v32  ;;  %v3805_v7 = vpop.f32.mrb[28].mxu1  ;;  %2423 = vmatprep.subr.bf16.mxu0 %v3089_v48 }
 0x187   :  { %v3197_v45 = vpop.eup %3196  ;;  %v1605_v19 = vadd.f32 1.0, %v3195_v0  ;;  %3214 = vpow2.f32 %v2853_v40  ;;  %v1849_v26 = vmul.f32 %v1785_v55, %v3724_v38  ;;  %v3810_v13 = vpop.f32.mrb[29].mxu1  ;;  %v2856_v21 = vmul.f32 -1.442695, %v3805_v7  ;;  %v3093_v40 = vld [vmem:[#allocation7 + $0x170] ss:$8 sps:$4 sm:$0xff]  }
 0x188   :  { %v3199_v14 = vpop.eup %3198  ;;  %3216 = vrcp.f32 %v1604_v41  ;;  %v1608_v15 = vadd.f32 1.0, %v3197_v45  ;;  %v1896_v47 = vpack.c.bf16 %v1848_v12, %v1844_v52  ;;  %v3813_v32 = vpop.f32.mrb[30].mxu1  ;;  %v2857_v57 = vmul.f32 -1.442695, %v3810_v13  ;;  %v3098_v55 = vld [vmem:[#allocation7 + $0x184] ss:$8 sps:$4 sm:$0xff]  }
 0x189   :  { %3218 = vrcp.f32 %v1605_v19  ;;  %v1609_v6 = vadd.f32 1.0, %v3199_v14  ;;  %v1897_v51 = vpack.c.bf16 %v1849_v26, %v1845_v9  ;;  %v3816_v23 = vpop.f32.mrb[31].mxu1  ;;  %2424 = vmatpush1.bf16.msra.mxu0 %v3087_v63  ;;  %v2860_v39 = vmul.f32 -1.442695, %v3813_v32  ;;  %v3821_v2 = vpop.f32.mrb[28].mxu0 }
 0x18a   :  { %v3201_v38 = vpop.eup %3200  ;;  %3220 = vrcp.f32 %v1608_v15  ;;  %2425 = vmatprep.subr.bf16.mxu0 %v3092_v10  ;;  %v2861_v16 = vmul.f32 -1.442695, %v3816_v23  ;;  %v3824_v34 = vpop.f32.mrb[29].mxu0 }
 0x18b   :  { %v3203_v25 = vpop.eup %3202  ;;  %v1788_v24 = vmul.f32 %v3201_v38, %v3722_v35  ;;  %3222 = vrcp.f32 %v1609_v6  ;;  %2362 = vmatprep.mubr.bf16.mxu0 %v1897_v51  ;;  %v3828_v35 = vpop.f32.mrb[30].mxu0 }
 0x18c   :  { %v3205_v31 = vpop.eup %3204  ;;  %v1789_v27 = vmul.f32 %v3203_v25, %v3727_v44  ;;  %3224 = vpow2.f32 %v2856_v21  ;;  %2363 = vmatmul.mubr.bf16.gmra.mrb[44].mxu0 %v1896_v47  ;;  %v3834_v5 = vpop.f32.mrb[31].mxu0 }
 0x18d   :  { %v3207_v48 = vpop.eup %3206  ;;  %v1792_v42 = vmul.f32 %v3205_v31, %v3730_v53  ;;  %3226 = vpow2.f32 %v2857_v57  ;;  %v1852_v50 = vmul.f32 %v1788_v24, %v3740_v60  ;;  %2426 = vmatpush1.bf16.msra.mxu0 %v3090_v30 }
 0x18e   :  { %v3209_v58 = vpop.eup %3208  ;;  %v1793_v49 = vmul.f32 %v3207_v48, %v3734_v61  ;;  %3228 = vpow2.f32 %v2860_v39  ;;  %v1853_v44 = vmul.f32 %v1789_v27, %v3744_v17  ;;  %v3832_v52 = vpop.f32.mrb[32].mxu1  ;;  %2427 = vmatprep.subr.bf16.mxu0 %v3095_v62 }
 0x18f   :  { %v3211_v53 = vpop.eup %3210  ;;  %v1612_v9 = vadd.f32 1.0, %v3209_v58  ;;  %3230 = vpow2.f32 %v2861_v16  ;;  %v1856_v60 = vmul.f32 %v1792_v42, %v3747_v29  ;;  %v3837_v63 = vpop.f32.mrb[33].mxu1  ;;  %v3096_v29 = vld [vmem:[#allocation7 + $0x180] ss:$8 sps:$4 sm:$0xff]  }
 0x190   :  { %v3213_v0 = vpop.eup %3212  ;;  %v1613_v41 = vadd.f32 1.0, %v3211_v53  ;;  %v1857_v61 = vmul.f32 %v1793_v49, %v3752_v33  ;;  %v3840_v12 = vpop.f32.mrb[34].mxu1  ;;  %v3101_v33 = vld [vmem:[#allocation7 + $0x194] ss:$8 sps:$4 sm:$0xff]  }
 0x191   :  { %v3215_v17 = vpop.eup %3214  ;;  %3232 = vrcp.f32 %v1612_v9  ;;  %v1616_v10 = vadd.f32 1.0, %v3213_v0  ;;  %v1900_v45 = vpack.c.bf16 %v1856_v60, %v1852_v50  ;;  %v3842_v19 = vpop.f32.mrb[35].mxu1  ;;  %2428 = vmatpush1.bf16.msra.mxu0 %v3093_v40  ;;  %v3107_v53 = vld [vmem:[#allocation7 + $0x1b4] ss:$8 sps:$4 sm:$0xff]  }
 0x192   :  { %v3217_v26 = vpop.eup %3216  ;;  %3234 = vrcp.f32 %v1613_v41  ;;  %v1617_v14 = vadd.f32 1.0, %v3215_v17  ;;  %v1901_v15 = vpack.c.bf16 %v1857_v61, %v1853_v44  ;;  %2429 = vmatprep.subr.bf16.mxu0 %v3098_v55 }
 0x193   :  { %v3219_v47 = vpop.eup %3218  ;;  %v1796_v21 = vmul.f32 %v3217_v26, %v3750_v22  ;;  %3236 = vrcp.f32 %v1616_v10  ;;  %v3099_v22 = vld [vmem:[#allocation7 + $0x190] ss:$8 sps:$4 sm:$0xff]  }
 0x194   :  { %v3221_v6 = vpop.eup %3220  ;;  %v1797_v51 = vmul.f32 %v3219_v47, %v3755_v36  ;;  %3238 = vrcp.f32 %v1617_v14  ;;  %2372 = vmatprep.mubr.bf16.mxu0 %v1901_v15  ;;  %v3110_v15 = vld [vmem:[#allocation7 + $0x1c4] ss:$8 sps:$4 sm:$0xff]  }
 0x195   :  { %v3223_v57 = vpop.eup %3222  ;;  %v1800_v30 = vmul.f32 %v3221_v6, %v3758_v37  ;;  %v1860_v38 = vmul.f32 %v1796_v21, %v3766_v56  ;;  %2373 = vmatmul.mubr.bf16.gmra.mrb[48].mxu0 %v1900_v45  ;;  %v3104_v37 = vld [vmem:[#allocation7 + $0x1a4] ss:$8 sps:$4 sm:$0xff]   ;;  %v3105_v45 = vld [vmem:[#allocation7 + $0x1b0] ss:$8 sps:$4 sm:$0xff]   ;;  %v3108_v6 = vld [vmem:[#allocation7 + $0x1c0] ss:$8 sps:$4 sm:$0xff]  }
 0x196   :  { %v3225_v39 = vpop.eup %3224  ;;  %v1801_v62 = vmul.f32 %v3223_v57, %v3761_v43  ;;  %v1861_v25 = vmul.f32 %v1797_v51, %v3770_v4  ;;  %v3850_v24 = vpop.f32.mrb[36].mxu1  ;;  %2430 = vmatpush1.bf16.msra.mxu0 %v3096_v29  ;;  %v3113_v51 = vld [vmem:[#allocation7 + $0x1d4] ss:$8 sps:$4 sm:$0xff]  }
 0x197   :  { %v3227_v16 = vpop.eup %3226  ;;  %v1620_v31 = vadd.f32 1.0, %v3225_v39  ;;  %v1864_v36 = vmul.f32 %v1800_v30, %v3774_v11  ;;  %v3853_v27 = vpop.f32.mrb[37].mxu1  ;;  %2431 = vmatprep.subr.bf16.mxu0 %v3101_v33  ;;  %v3102_v11 = vld [vmem:[#allocation7 + $0x1a0] ss:$8 sps:$4 sm:$0xff]  }
 0x198   :  { %v3229_v48 = vpop.eup %3228  ;;  %v1621_v56 = vadd.f32 1.0, %v3227_v16  ;;  %v1865_v42 = vmul.f32 %v1801_v62, %v3779_v20  ;;  %v3856_v50 = vpop.f32.mrb[38].mxu1  ;;  %v2802_v16 = vmul.f32 -1.442695, %v3832_v52 }
 0x199   :  { %v3231_v43 = vpop.eup %3230  ;;  %3240 = vrcp.f32 %v1620_v31  ;;  %v1624_v4 = vadd.f32 1.0, %v3229_v48  ;;  %v1904_v40 = vpack.c.bf16 %v1864_v36, %v1860_v38  ;;  %v3858_v58 = vpop.f32.mrb[39].mxu1  ;;  %v3114_v48 = vld [vmem:[#allocation7 + $0x1e0] ss:$8 sps:$4 sm:$0xff]  }
 0x19a   :  { %3242 = vrcp.f32 %v1621_v56  ;;  %v1625_v49 = vadd.f32 1.0, %v3231_v43  ;;  %v1905_v44 = vpack.c.bf16 %v1865_v42, %v1861_v25  ;;  %2432 = vmatpush1.bf16.msra.mxu0 %v3099_v22  ;;  %v2806_v56 = vmul.f32 -1.442695, %v3840_v12  ;;  %v3119_v42 = vld [vmem:[#allocation7 + $0x1f4] ss:$8 sps:$4 sm:$0xff]  }
 0x19b   :  { %v3233_v55 = vpop.eup %3232  ;;  %3244 = vrcp.f32 %v1624_v4  ;;  %2433 = vmatprep.subr.bf16.mxu0 %v3104_v37 }
 0x19c   :  { %v3235_v9 = vpop.eup %3234  ;;  %v1804_v20 = vmul.f32 %v3233_v55, %v3777_v54  ;;  %3246 = vrcp.f32 %v1625_v49  ;;  %2382 = vmatprep.mubr.bf16.mxu0 %v1905_v44  ;;  %v2811_v49 = vmul.f32 -1.442695, %v3853_v27 }
 0x19d   :  { %v3237_v60 = vpop.eup %3236  ;;  %v1805_v0 = vmul.f32 %v3235_v9, %v3782_v18  ;;  %2383 = vmatmul.mubr.bf16.gmra.mrb[52].mxu0 %v1904_v40  ;;  %3248 = vpow2.f32 %v2802_v16  ;;  %v3117_v40 = vld [vmem:[#allocation7 + $0x1f0] ss:$8 sps:$4 sm:$0xff]  }
 0x19e   :  { %v3239_v41 = vpop.eup %3238  ;;  %v1808_v61 = vmul.f32 %v3237_v60, %v3785_v3  ;;  %v1868_v17 = vmul.f32 %v1804_v20, %v3794_v46  ;;  %v3864_v10 = vpop.f32.mrb[40].mxu1  ;;  %2434 = vmatpush1.bf16.msra.mxu0 %v3102_v11  ;;  %v2814_v11 = vmul.f32 -1.442695, %v3856_v50 }
 0x19f   :  { %v1809_v26 = vmul.f32 %v3239_v41, %v3788_v28  ;;  %v1869_v14 = vmul.f32 %v1805_v0, %v3798_v1  ;;  %v3868_v54 = vpop.f32.mrb[41].mxu1  ;;  %2435 = vmatprep.subr.bf16.mxu0 %v3107_v53  ;;  %v2815_v53 = vmul.f32 -1.442695, %v3858_v58  ;;  %v2818_v0 = vmul.f32 -1.442695, %v3864_v10 }
 0x1a0   :  { %v1872_v18 = vmul.f32 %v1808_v61, %v3802_v59  ;;  %v3871_v29 = vpop.f32.mrb[42].mxu1  ;;  %v2819_v61 = vmul.f32 -1.442695, %v3868_v54 }
 0x1a1   :  { %v1873_v3 = vmul.f32 %v1809_v26, %v3807_v8  ;;  %v3874_v47 = vpop.f32.mrb[43].mxu1 }
 0x1a2   :  { %v1908_v46 = vpack.c.bf16 %v1872_v18, %v1868_v17  ;;  %2436 = vmatpush1.bf16.msra.mxu0 %v3105_v45 }
 0x1a3   :  { %v3241_v21 = vpop.eup %3240  ;;  %v1909_v33 = vpack.c.bf16 %v1873_v3, %v1869_v14  ;;  %2437 = vmatprep.subr.bf16.mxu0 %v3110_v15  ;;  %v2822_v3 = vmul.f32 -1.442695, %v3871_v29 }
 0x1a4   :  { %v3243_v28 = vpop.eup %3242  ;;  %v1812_v1 = vmul.f32 %v3241_v21, %v3805_v7  ;;  %v3111_v7 = vld [vmem:[#allocation7 + $0x1d0] ss:$8 sps:$4 sm:$0xff]  }
 0x1a5   :  { %v3245_v57 = vpop.eup %3244  ;;  %v1813_v30 = vmul.f32 %v3243_v28, %v3810_v13  ;;  %2392 = vmatprep.mubr.bf16.mxu0 %v1909_v33 }
 0x1a6   :  { %v3247_v59 = vpop.eup %3246  ;;  %v1816_v38 = vmul.f32 %v3245_v57, %v3813_v32  ;;  %v1876_v8 = vmul.f32 %v1812_v1, %v3821_v2  ;;  %2393 = vmatmul.mubr.bf16.gmra.mrb[56].mxu0 %v1908_v46  ;;  %v3880_v39 = vpop.f32.mrb[44].mxu1  ;;  %v3116_v32 = vld [vmem:[#allocation7 + $0x1e4] ss:$8 sps:$4 sm:$0xff]   ;;  %v2803_v2 = vmul.f32 -1.442695, %v3837_v63 }
 0x1a7   :  { %v1817_v62 = vmul.f32 %v3247_v59, %v3816_v23  ;;  %v1877_v25 = vmul.f32 %v1813_v30, %v3824_v34  ;;  %v3884_v22 = vpop.f32.mrb[45].mxu1  ;;  %2438 = vmatpush1.bf16.msra.mxu0 %v3108_v6  ;;  %v3249_v9 = vpop.eup %3248  ;;  %v2823_v46 = vmul.f32 -1.442695, %v3874_v47  ;;  %v2826_v57 = vmul.f32 -1.442695, %v3880_v39 }
 0x1a8   :  { %v1880_v13 = vmul.f32 %v1816_v38, %v3828_v35  ;;  %v3888_v31 = vpop.f32.mrb[46].mxu1  ;;  %2439 = vmatprep.subr.bf16.mxu0 %v3113_v51  ;;  %3250 = vpow2.f32 %v2803_v2  ;;  %v2807_v35 = vmul.f32 -1.442695, %v3842_v19  ;;  %v1566_v45 = vadd.f32 1.0, %v3249_v9 }
 0x1a9   :  { %v1881_v36 = vmul.f32 %v1817_v62, %v3834_v5  ;;  %v3892_v37 = vpop.f32.mrb[47].mxu1  ;;  %v2810_v5 = vmul.f32 -1.442695, %v3850_v24  ;;  %3252 = vpow2.f32 %v2806_v56  ;;  %v2827_v16 = vmul.f32 -1.442695, %v3884_v22 }
 0x1aa   :  { %v1912_v23 = vpack.c.bf16 %v1880_v13, %v1876_v8  ;;  %3254 = vpow2.f32 %v2807_v35  ;;  %v2830_v13 = vmul.f32 -1.442695, %v3888_v31 }
 0x1ab   :  { %v1913_v34 = vpack.c.bf16 %v1881_v36, %v1877_v25  ;;  %2440 = vmatpush1.bf16.msra.mxu0 %v3111_v7  ;;  %3256 = vpow2.f32 %v2810_v5 }
 0x1ac   :  { %2441 = vmatprep.subr.bf16.mxu0 %v3116_v32  ;;  %3258 = vpow2.f32 %v2811_v49 }
 0x1ad   :  { %2402 = vmatprep.mubr.bf16.mxu0 %v1913_v34  ;;  %3260 = vpow2.f32 %v2814_v11 }
 0x1ae   :  { %2403 = vmatmul.mubr.bf16.gmra.mrb[60].mxu0 %v1912_v23  ;;  %v3896_v43 = vpop.f32.mrb[48].mxu1  ;;  %3262 = vpow2.f32 %v2815_v53  ;;  %v2831_v23 = vmul.f32 -1.442695, %v3892_v37 }
 0x1af   :  { %v3899_v4 = vpop.f32.mrb[49].mxu1  ;;  %2442 = vmatpush1.bf16.msra.mxu0 %v3114_v48  ;;  %3264 = vpow2.f32 %v2818_v0  ;;  %v2834_v56 = vmul.f32 -1.442695, %v3896_v43 }
 0x1b0   :  { %v3902_v44 = vpop.f32.mrb[50].mxu1  ;;  %2443 = vmatprep.subr.bf16.mxu0 %v3119_v42  ;;  %3266 = vpow2.f32 %v2819_v61 }
 0x1b1   :  { %v3905_v55 = vpop.f32.mrb[51].mxu1  ;;  %3268 = vrcp.f32 %v1566_v45  ;;  %v2838_v61 = vmul.f32 -1.442695, %v3902_v44 }
 0x1b2   :  { %v3251_v60 = vpop.eup %3250 }
 0x1b3   :  { %2444 = vmatpush1.bf16.msra.mxu0 %v3117_v40  ;;  %v3253_v14 = vpop.eup %3252  ;;  %v1567_v15 = vadd.f32 1.0, %v3251_v60  ;;  %v2835_v60 = vmul.f32 -1.442695, %v3899_v4 }
 0x1b4   :  { %v3255_v18 = vpop.eup %3254  ;;  %v1570_v33 = vadd.f32 1.0, %v3253_v14 }
 0x1b5   :  { %v3257_v21 = vpop.eup %3256  ;;  %3270 = vrcp.f32 %v1567_v15  ;;  %v1571_v28 = vadd.f32 1.0, %v3255_v18 }
 0x1b6   :  { %v3908_v20 = vpop.f32.mrb[52].mxu1  ;;  %v3259_v6 = vpop.eup %3258  ;;  %3272 = vpow2.f32 %v2822_v3  ;;  %v1574_v59 = vadd.f32 1.0, %v3257_v21 }
 0x1b7   :  { %v3911_v41 = vpop.f32.mrb[53].mxu1  ;;  %v3261_v51 = vpop.eup %3260  ;;  %3274 = vpow2.f32 %v2823_v46  ;;  %v1575_v8 = vadd.f32 1.0, %v3259_v6 }
 0x1b8   :  { %v3914_v17 = vpop.f32.mrb[54].mxu1  ;;  %3276 = vrcp.f32 %v1570_v33  ;;  %v3263_v25 = vpop.eup %3262  ;;  %v1578_v7 = vadd.f32 1.0, %v3261_v51  ;;  %v2839_v33 = vmul.f32 -1.442695, %v3905_v55 }
 0x1b9   :  { %v3916_v26 = vpop.f32.mrb[55].mxu1  ;;  %3278 = vrcp.f32 %v1571_v28  ;;  %v3265_v32 = vpop.eup %3264  ;;  %v1579_v2 = vadd.f32 1.0, %v3263_v25 }
 0x1ba   :  { %3280 = vpow2.f32 %v2826_v57  ;;  %v3267_v36 = vpop.eup %3266  ;;  %v1582_v5 = vadd.f32 1.0, %v3265_v32  ;;  %v2842_v57 = vmul.f32 -1.442695, %v3908_v20 }
 0x1bb   :  { %3282 = vrcp.f32 %v1574_v59  ;;  %v3269_v48 = vpop.eup %3268  ;;  %v1583_v11 = vadd.f32 1.0, %v3267_v36 }
 0x1bc   :  { %3284 = vrcp.f32 %v1575_v8  ;;  %v1758_v18 = vmul.f32 %v3269_v48, %v3832_v52 }
 0x1bd   :  { %3286 = vrcp.f32 %v1578_v7  ;;  %v2843_v7 = vmul.f32 -1.442695, %v3911_v41 }
 0x1be   :  { %v3920_v1 = vpop.f32.mrb[56].mxu1  ;;  %3288 = vpow2.f32 %v2827_v16 }
 0x1bf   :  { %v3923_v30 = vpop.f32.mrb[57].mxu1  ;;  %v3271_v35 = vpop.eup %3270  ;;  %3290 = vpow2.f32 %v2830_v13 }
 0x1c0   :  { %v3925_v38 = vpop.f32.mrb[58].mxu1  ;;  %v3273_v49 = vpop.eup %3272  ;;  %3292 = vrcp.f32 %v1579_v2  ;;  %v1759_v21 = vmul.f32 %v3271_v35, %v3837_v63 }
 0x1c1   :  { %v3927_v62 = vpop.f32.mrb[59].mxu1  ;;  %v3275_v9 = vpop.eup %3274  ;;  %3294 = vpow2.f32 %v2831_v23  ;;  %v1586_v14 = vadd.f32 1.0, %v3273_v49 }
 0x1c2   :  { %v3277_v0 = vpop.eup %3276  ;;  %3296 = vpow2.f32 %v2834_v56  ;;  %v1587_v3 = vadd.f32 1.0, %v3275_v9  ;;  %v2846_v56 = vmul.f32 -1.442695, %v3914_v17 }
 0x1c3   :  { %v3279_v45 = vpop.eup %3278  ;;  %3298 = vrcp.f32 %v1582_v5  ;;  %v1762_v51 = vmul.f32 %v3277_v0, %v3840_v12 }
 0x1c4   :  { %v3281_v15 = vpop.eup %3280  ;;  %3300 = vrcp.f32 %v1583_v11  ;;  %v1763_v52 = vmul.f32 %v3279_v45, %v3842_v19  ;;  %v2847_v45 = vmul.f32 -1.442695, %v3916_v26 }
 0x1c5   :  { %v3283_v46 = vpop.eup %3282  ;;  %3302 = vpow2.f32 %v2835_v60  ;;  %v1590_v23 = vadd.f32 1.0, %v3281_v15 }
 0x1c6   :  { %v3932_v34 = vpop.f32.mrb[60].mxu1  ;;  %v3285_v28 = vpop.eup %3284  ;;  %3304 = vpow2.f32 %v2838_v61  ;;  %v1766_v9 = vmul.f32 %v3283_v46, %v3850_v24 }
 0x1c7   :  { %v3935_v42 = vpop.f32.mrb[61].mxu1  ;;  %v3287_v25 = vpop.eup %3286  ;;  %3306 = vrcp.f32 %v1586_v14  ;;  %v1767_v61 = vmul.f32 %v3285_v28, %v3853_v27 }
 0x1c8   :  { %v3937_v40 = vpop.f32.mrb[62].mxu1  ;;  %v3289_v13 = vpop.eup %3288  ;;  %3308 = vrcp.f32 %v1587_v3 }
 0x1c9   :  { %v3939_v53 = vpop.f32.mrb[63].mxu1  ;;  %v3291_v36 = vpop.eup %3290  ;;  %3310 = vpow2.f32 %v2839_v33  ;;  %v1591_v19 = vadd.f32 1.0, %v3289_v13 }
 0x1ca   :  { %v3293_v48 = vpop.eup %3292  ;;  %3312 = vpow2.f32 %v2842_v57  ;;  %v1594_v60 = vadd.f32 1.0, %v3291_v36  ;;  %v2850_v57 = vmul.f32 -1.442695, %v3920_v1 }
 0x1cb   :  { %v3295_v5 = vpop.eup %3294  ;;  %3314 = vpow2.f32 %v2843_v7  ;;  %v1771_v24 = vmul.f32 %v3293_v48, %v3858_v58 }
 0x1cc   :  { %v3297_v11 = vpop.eup %3296  ;;  %3316 = vrcp.f32 %v1590_v23  ;;  %v1595_v3 = vadd.f32 1.0, %v3295_v5  ;;  %v2854_v23 = vmul.f32 -1.442695, %v3925_v38 }
 0x1cd   :  { %v3299_v0 = vpop.eup %3298  ;;  %3318 = vpow2.f32 %v2846_v56  ;;  %v1598_v46 = vadd.f32 1.0, %v3297_v11  ;;  %v2855_v56 = vmul.f32 -1.442695, %v3927_v62 }
 0x1ce   :  { %v1293_v6 = vpop.f32.mrb[64].mxu1  ;;  %v3301_v15 = vpop.eup %3300  ;;  %3320 = vrcp.f32 %v1591_v19  ;;  %v1774_v36 = vmul.f32 %v3299_v0, %v3864_v10 }
 0x1cf   :  { %v1822_v59 = vmul.f32 %v1758_v18, %v1293_v6  ;;  %v1295_v8 = vpop.f32.mrb[65].mxu1  ;;  %v1770_v18 = vmul.f32 %v3287_v25, %v3856_v50  ;;  %v3303_v6 = vpop.eup %3302  ;;  %3322 = vrcp.f32 %v1594_v60  ;;  %v2851_v50 = vmul.f32 -1.442695, %v3923_v30 }
 0x1d0   :  { %v1823_v16 = vmul.f32 %v1759_v21, %v1295_v8  ;;  %v1297_v63 = vpop.f32.mrb[66].mxu1  ;;  %v3305_v28 = vpop.eup %3304  ;;  %3324 = vpow2.f32 %v2847_v45  ;;  %v1775_v48 = vmul.f32 %v3301_v15, %v3868_v54 }
 0x1d1   :  { %v1826_v32 = vmul.f32 %v1762_v51, %v1297_v63  ;;  %v1299_v2 = vpop.f32.mrb[67].mxu1  ;;  %3326 = vrcp.f32 %v1595_v3  ;;  %v1602_v13 = vadd.f32 1.0, %v3305_v28  ;;  %v2862_v28 = vmul.f32 -1.442695, %v3937_v40 }
 0x1d2   :  { %v1827_v12 = vmul.f32 %v1763_v52, %v1299_v2  ;;  %v3307_v52 = vpop.eup %3306  ;;  %3328 = vrcp.f32 %v1598_v46 }
 0x1d3   :  { %v1886_v35 = vpack.c.bf16 %v1826_v32, %v1822_v59  ;;  %v3309_v7 = vpop.eup %3308  ;;  %3330 = vpow2.f32 %v2850_v57  ;;  %v1778_v5 = vmul.f32 %v3307_v52, %v3871_v29  ;;  %v2858_v29 = vmul.f32 -1.442695, %v3932_v34 }
 0x1d4   :  { %v1887_v49 = vpack.c.bf16 %v1827_v12, %v1823_v16  ;;  %v1599_v16 = vadd.f32 1.0, %v3303_v6  ;;  %v3311_v58 = vpop.eup %3310  ;;  %3332 = vpow2.f32 %v2851_v50  ;;  %v1779_v10 = vmul.f32 %v3309_v7, %v3874_v47 }
 0x1d5   :  { %v3313_v2 = vpop.eup %3312  ;;  %v1603_v19 = vadd.f32 1.0, %v3311_v58 }
 0x1d6   :  { %v1303_v14 = vpop.f32.mrb[68].mxu1  ;;  %2445 = vmatprep.mubr.bf16.mxu0 %v1887_v49  ;;  %v3315_v12 = vpop.eup %3314  ;;  %3334 = vrcp.f32 %v1599_v16  ;;  %v1606_v60 = vadd.f32 1.0, %v3313_v2 }
 0x1d7   :  { %v1830_v21 = vmul.f32 %v1766_v9, %v1303_v14  ;;  %v1305_v33 = vpop.f32.mrb[69].mxu1  ;;  %2446 = vmatmul.mubr.bf16.vlgmr.msra.gmra.mrb[32].mxu0 %v1886_v35  ;;  %v3317_v9 = vpop.eup %3316  ;;  %3336 = vrcp.f32 %v1602_v13  ;;  %v1607_v45 = vadd.f32 1.0, %v3315_v12 }
 0x1d8   :  { %v1831_v51 = vmul.f32 %v1767_v61, %v1305_v33  ;;  %v1307_v27 = vpop.f32.mrb[70].mxu1  ;;  %v3319_v54 = vpop.eup %3318  ;;  %3338 = vpow2.f32 %v2854_v23  ;;  %v2859_v33 = vmul.f32 -1.442695, %v3935_v42 }
 0x1d9   :  { %v1834_v59 = vmul.f32 %v1770_v18, %v1307_v27  ;;  %v1309_v8 = vpop.f32.mrb[71].mxu1  ;;  %v3321_v18 = vpop.eup %3320  ;;  %3340 = vpow2.f32 %v2855_v56  ;;  %v1782_v27 = vmul.f32 %v3317_v9, %v3880_v39 }
 0x1da   :  { %v1835_v25 = vmul.f32 %v1771_v24, %v1309_v8  ;;  %3342 = vrcp.f32 %v1603_v19  ;;  %v1610_v24 = vadd.f32 1.0, %v3319_v54  ;;  %v2863_v8 = vmul.f32 -1.442695, %v3939_v53 }
 0x1db   :  { %v1890_v63 = vpack.c.bf16 %v1834_v59, %v1830_v21  ;;  %v3323_v21 = vpop.eup %3322  ;;  %3344 = vrcp.f32 %v1606_v60  ;;  %v1783_v59 = vmul.f32 %v3321_v18, %v3884_v22 }
 0x1dc   :  { %v1891_v32 = vpack.c.bf16 %v1835_v25, %v1831_v51  ;;  %v3325_v47 = vpop.eup %3324  ;;  %3346 = vrcp.f32 %v1607_v45  ;;  %v1786_v25 = vmul.f32 %v3323_v21, %v3888_v31 }
 0x1dd   :  { %v3327_v51 = vpop.eup %3326  ;;  %3348 = vpow2.f32 %v2858_v29  ;;  %v1611_v7 = vadd.f32 1.0, %v3325_v47 }
 0x1de   :  { %v1313_v35 = vpop.f32.mrb[72].mxu1  ;;  %2455 = vmatprep.mubr.bf16.mxu0 %v1891_v32  ;;  %v3329_v57 = vpop.eup %3328  ;;  %3350 = vpow2.f32 %v2859_v33  ;;  %v1787_v58 = vmul.f32 %v3327_v51, %v3892_v37 }
 0x1df   :  { %v1838_v49 = vmul.f32 %v1774_v36, %v1313_v35  ;;  %v1315_v11 = vpop.f32.mrb[73].mxu1  ;;  %2456 = vmatmul.mubr.bf16.gmra.mrb[36].mxu0 %v1890_v63  ;;  %v3331_v50 = vpop.eup %3330  ;;  %3352 = vrcp.f32 %v1610_v24 }
 0x1e0   :  { %v1839_v0 = vmul.f32 %v1775_v48, %v1315_v11  ;;  %v1317_v61 = vpop.f32.mrb[74].mxu1  ;;  %v3333_v39 = vpop.eup %3332  ;;  %3354 = vpow2.f32 %v2862_v28  ;;  %v1614_v35 = vadd.f32 1.0, %v3331_v50 }
 0x1e1   :  { %v1842_v14 = vmul.f32 %v1778_v5, %v1317_v61  ;;  %v1319_v15 = vpop.f32.mrb[75].mxu1  ;;  %v3335_v22 = vpop.eup %3334  ;;  %3356 = vpow2.f32 %v2863_v8  ;;  %v1615_v37 = vadd.f32 1.0, %v3333_v39 }
 0x1e2   :  { %v1843_v3 = vmul.f32 %v1779_v10, %v1319_v15  ;;  %v3337_v23 = vpop.eup %3336  ;;  %3358 = vrcp.f32 %v1611_v7  ;;  %v1791_v9 = vmul.f32 %v3335_v22, %v3899_v4 }
 0x1e3   :  { %v1894_v6 = vpack.c.bf16 %v1842_v14, %v1838_v49  ;;  %v3339_v48 = vpop.eup %3338  ;;  %v1790_v49 = vmul.f32 %v3329_v57, %v3896_v43  ;;  %v1794_v61 = vmul.f32 %v3337_v23, %v3902_v44  ;;  %3360 = vrcp.f32 %v1614_v35 }
 0x1e4   :  { %v1895_v46 = vpack.c.bf16 %v1843_v3, %v1839_v0  ;;  %v3341_v56 = vpop.eup %3340  ;;  %v1618_v10 = vadd.f32 1.0, %v3339_v48  ;;  %3362 = vrcp.f32 %v1615_v37 }
 0x1e5   :  { %v3343_v19 = vpop.eup %3342  ;;  %v1619_v54 = vadd.f32 1.0, %v3341_v56 }
 0x1e6   :  { %v1323_v52 = vpop.f32.mrb[76].mxu1  ;;  %2465 = vmatprep.mubr.bf16.mxu0 %v1895_v46  ;;  %v3345_v11 = vpop.eup %3344  ;;  %v1795_v18 = vmul.f32 %v3343_v19, %v3905_v55  ;;  %3364 = vrcp.f32 %v1618_v10 }
 0x1e7   :  { %v1846_v16 = vmul.f32 %v1782_v27, %v1323_v52  ;;  %v1325_v63 = vpop.f32.mrb[77].mxu1  ;;  %2466 = vmatmul.mubr.bf16.gmra.mrb[40].mxu0 %v1894_v6  ;;  %v3347_v0 = vpop.eup %3346  ;;  %3366 = vrcp.f32 %v1619_v54  ;;  %v1798_v28 = vmul.f32 %v3345_v11, %v3908_v20 }
 0x1e8   :  { %v1847_v13 = vmul.f32 %v1783_v59, %v1325_v63  ;;  %v1327_v32 = vpop.f32.mrb[78].mxu1  ;;  %v3349_v15 = vpop.eup %3348  ;;  %v1799_v57 = vmul.f32 %v3347_v0, %v3911_v41 }
 0x1e9   :  { %v1850_v2 = vmul.f32 %v1786_v25, %v1327_v32  ;;  %v1329_v36 = vpop.f32.mrb[79].mxu1  ;;  %v3351_v3 = vpop.eup %3350  ;;  %v1622_v46 = vadd.f32 1.0, %v3349_v15 }
 0x1ea   :  { %v1851_v12 = vmul.f32 %v1787_v58, %v1329_v36  ;;  %v3353_v33 = vpop.eup %3352  ;;  %v1623_v55 = vadd.f32 1.0, %v3351_v3 }
 0x1eb   :  { %v1898_v31 = vpack.c.bf16 %v1850_v2, %v1846_v16  ;;  %v3355_v47 = vpop.eup %3354  ;;  %v1802_v52 = vmul.f32 %v3353_v33, %v3914_v17  ;;  %3368 = vrcp.f32 %v1622_v46 }
 0x1ec   :  { %v1899_v5 = vpack.c.bf16 %v1851_v12, %v1847_v13  ;;  %v3357_v24 = vpop.eup %3356  ;;  %v1626_v59 = vadd.f32 1.0, %v3355_v47  ;;  %3370 = vrcp.f32 %v1623_v55 }
 0x1ed   :  { %v3359_v27 = vpop.eup %3358  ;;  %v1627_v50 = vadd.f32 1.0, %v3357_v24 }
 0x1ee   :  { %v1333_v60 = vpop.f32.mrb[80].mxu1  ;;  %2475 = vmatprep.mubr.bf16.mxu0 %v1899_v5  ;;  %v1803_v16 = vmul.f32 %v3359_v27, %v3916_v26  ;;  %v3361_v13 = vpop.eup %3360  ;;  %3372 = vrcp.f32 %v1626_v59 }
 0x1ef   :  { %v1854_v45 = vmul.f32 %v1790_v49, %v1333_v60  ;;  %v1335_v14 = vpop.f32.mrb[81].mxu1  ;;  %2476 = vmatmul.mubr.bf16.gmra.mrb[44].mxu0 %v1898_v31  ;;  %v3363_v32 = vpop.eup %3362  ;;  %3374 = vrcp.f32 %v1627_v50  ;;  %v1806_v23 = vmul.f32 %v3361_v13, %v3920_v1 }
 0x1f0   :  { %v1855_v29 = vmul.f32 %v1791_v9, %v1335_v14  ;;  %v1337_v43 = vpop.f32.mrb[82].mxu1  ;;  %v3365_v2 = vpop.eup %3364  ;;  %v1807_v12 = vmul.f32 %v3363_v32, %v3923_v30 }
 0x1f1   :  { %v1858_v21 = vmul.f32 %v1794_v61, %v1337_v43  ;;  %v1339_v4 = vpop.f32.mrb[83].mxu1  ;;  %v3367_v36 = vpop.eup %3366  ;;  %v1810_v48 = vmul.f32 %v3365_v2, %v3925_v38 }
 0x1f2   :  { %v1859_v6 = vmul.f32 %v1795_v18, %v1339_v4  ;;  %v1811_v35 = vmul.f32 %v3367_v36, %v3927_v62 }
 0x1f3   :  { %v1902_v44 = vpack.c.bf16 %v1858_v21, %v1854_v45 }
 0x1f4   :  { %v1903_v51 = vpack.c.bf16 %v1859_v6, %v1855_v29 }
 0x1f5   :  { %v3369_v11 = vpop.eup %3368 }
 0x1f6   :  { %v1343_v8 = vpop.f32.mrb[84].mxu1  ;;  %2485 = vmatprep.mubr.bf16.mxu0 %v1903_v51  ;;  %v3371_v10 = vpop.eup %3370  ;;  %v1814_v61 = vmul.f32 %v3369_v11, %v3932_v34 }
 0x1f7   :  { %v1862_v25 = vmul.f32 %v1798_v28, %v1343_v8  ;;  %v1345_v7 = vpop.f32.mrb[85].mxu1  ;;  %2486 = vmatmul.mubr.bf16.gmra.mrb[48].mxu0 %v1902_v44  ;;  %v1815_v38 = vmul.f32 %v3371_v10, %v3935_v42 }
 0x1f8   :  { %v1863_v63 = vmul.f32 %v1799_v57, %v1345_v7  ;;  %v1347_v39 = vpop.f32.mrb[86].mxu1  ;;  %v3373_v1 = vpop.eup %3372 }
 0x1f9   :  { %v1866_v58 = vmul.f32 %v1802_v52, %v1347_v39  ;;  %v1349_v20 = vpop.f32.mrb[87].mxu1  ;;  %v3375_v30 = vpop.eup %3374  ;;  %v1818_v45 = vmul.f32 %v3373_v1, %v3937_v40 }
 0x1fa   :  { %v1867_v41 = vmul.f32 %v1803_v16, %v1349_v20  ;;  %v1819_v15 = vmul.f32 %v3375_v30, %v3939_v53 }
 0x1fb   :  { %v1906_v22 = vpack.c.bf16 %v1866_v58, %v1862_v25 }
 0x1fc   :  { %v1907_v17 = vpack.c.bf16 %v1867_v41, %v1863_v63 }
 0x1fe   :  { %v1353_v26 = vpop.f32.mrb[88].mxu1  ;;  %2495 = vmatprep.mubr.bf16.mxu0 %v1907_v17 }
 0x1ff   :  { %v1870_v31 = vmul.f32 %v1806_v23, %v1353_v26  ;;  %v1355_v56 = vpop.f32.mrb[89].mxu1  ;;  %2496 = vmatmul.mubr.bf16.gmra.mrb[52].mxu0 %v1906_v22 }
 0x200   :  { %v1871_v5 = vmul.f32 %v1807_v12, %v1355_v56  ;;  %v1357_v19 = vpop.f32.mrb[90].mxu1 }
 0x201   :  { %v1874_v49 = vmul.f32 %v1810_v48, %v1357_v19  ;;  %v1359_v37 = vpop.f32.mrb[91].mxu1 }
 0x202   :  { %v1875_v9 = vmul.f32 %v1811_v35, %v1359_v37 }
 0x203   :  { %v1910_v60 = vpack.c.bf16 %v1874_v49, %v1870_v31 }
 0x204   :  { %v1911_v0 = vpack.c.bf16 %v1875_v9, %v1871_v5 }
 0x206   :  { %v1363_v54 = vpop.f32.mrb[92].mxu1  ;;  %2505 = vmatprep.mubr.bf16.mxu0 %v1911_v0 }
 0x207   :  { %v1878_v62 = vmul.f32 %v1814_v61, %v1363_v54  ;;  %v1365_v14 = vpop.f32.mrb[93].mxu1  ;;  %2506 = vmatmul.mubr.bf16.gmra.mrb[56].mxu0 %v1910_v60 }
 0x208   :  { %v1879_v18 = vmul.f32 %v1815_v38, %v1365_v14  ;;  %v1367_v29 = vpop.f32.mrb[94].mxu1 }
 0x209   :  { %v1882_v43 = vmul.f32 %v1818_v45, %v1367_v29  ;;  %v1369_v3 = vpop.f32.mrb[95].mxu1 }
 0x20a   :  { %v1883_v21 = vmul.f32 %v1819_v15, %v1369_v3 }
 0x20b   :  { %v1914_v4 = vpack.c.bf16 %v1882_v43, %v1878_v62 }
 0x20c   :  { %v1915_v33 = vpack.c.bf16 %v1883_v21, %v1879_v18 }
 0x20e   :  { %2515 = vmatprep.mubr.bf16.mxu0 %v1915_v33 }
 0x20f   :  { %2516 = vmatmul.mubr.bf16.gmra.mrb[60].mxu0 %v1914_v4 }
 0x2aa   :  { %v2447_v34 = vpop.f32.mrb[32].mxu0 }
 0x2ab   :  { %v2449_v42 = vpop.f32.mrb[33].mxu0 }
 0x2ac   :  { %v2944_v6 = vpack.c.bf16 %v2449_v42, %v2447_v34  ;;  %v2451_v47 = vpop.f32.mrb[34].mxu0 }
 0x2ad   :  { %v2453_v44 = vpop.f32.mrb[35].mxu0 }
 0x2ae   :  { %2622 = vst [vmem:[#allocation8] sm:$0xff] %v2944_v6  ;;  %v2945_v40 = vpack.c.bf16 %v2453_v44, %v2451_v47 }
 0x2b0   :  { %2623 = vst [vmem:[#allocation8 + $0x8] sm:$0xff] %v2945_v40 }
 0x2b2   :  { %v2457_v24 = vpop.f32.mrb[36].mxu0 }
 0x2b3   :  { %v2459_v46 = vpop.f32.mrb[37].mxu0 }
 0x2b4   :  { %v2946_v53 = vpack.c.bf16 %v2459_v46, %v2457_v24  ;;  %v2461_v51 = vpop.f32.mrb[38].mxu0 }
 0x2b5   :  { %v2463_v27 = vpop.f32.mrb[39].mxu0 }
 0x2b6   :  { %2624 = vst [vmem:[#allocation8 + $0x10] sm:$0xff] %v2946_v53  ;;  %v2947_v28 = vpack.c.bf16 %v2463_v27, %v2461_v51 }
 0x2b8   :  { %2625 = vst [vmem:[#allocation8 + $0x18] sm:$0xff] %v2947_v28 }
 0x2ba   :  { %v2467_v55 = vpop.f32.mrb[40].mxu0 }
 0x2bb   :  { %v2469_v57 = vpop.f32.mrb[41].mxu0 }
 0x2bc   :  { %v2948_v59 = vpack.c.bf16 %v2469_v57, %v2467_v55  ;;  %v2471_v8 = vpop.f32.mrb[42].mxu0 }
 0x2bd   :  { %v2473_v52 = vpop.f32.mrb[43].mxu0 }
 0x2be   :  { %2626 = vst [vmem:[#allocation8 + $0x20] sm:$0xff] %v2948_v59  ;;  %v2949_v50 = vpack.c.bf16 %v2473_v52, %v2471_v8 }
 0x2c0   :  { %2627 = vst [vmem:[#allocation8 + $0x28] sm:$0xff] %v2949_v50 }
 0x2c2   :  { %v2477_v25 = vpop.f32.mrb[44].mxu0 }
 0x2c3   :  { %v2479_v7 = vpop.f32.mrb[45].mxu0 }
 0x2c4   :  { %v2950_v16 = vpack.c.bf16 %v2479_v7, %v2477_v25  ;;  %v2481_v63 = vpop.f32.mrb[46].mxu0 }
 0x2c5   :  { %v2483_v39 = vpop.f32.mrb[47].mxu0 }
 0x2c6   :  { %2628 = vst [vmem:[#allocation8 + $0x30] sm:$0xff] %v2950_v16  ;;  %v2951_v58 = vpack.c.bf16 %v2483_v39, %v2481_v63 }
 0x2c8   :  { %2629 = vst [vmem:[#allocation8 + $0x38] sm:$0xff] %v2951_v58 }
 0x2ca   :  { %v2487_v20 = vpop.f32.mrb[48].mxu0 }
 0x2cb   :  { %v2489_v13 = vpop.f32.mrb[49].mxu0 }
 0x2cc   :  { %v2952_v41 = vpack.c.bf16 %v2489_v13, %v2487_v20  ;;  %v2491_v32 = vpop.f32.mrb[50].mxu0 }
 0x2cd   :  { %v2493_v22 = vpop.f32.mrb[51].mxu0 }
 0x2ce   :  { %2630 = vst [vmem:[#allocation8 + $0x40] sm:$0xff] %v2952_v41  ;;  %v2953_v2 = vpack.c.bf16 %v2493_v22, %v2491_v32 }
 0x2d0   :  { %2631 = vst [vmem:[#allocation8 + $0x48] sm:$0xff] %v2953_v2 }
 0x2d2   :  { %v2497_v17 = vpop.f32.mrb[52].mxu0 }
 0x2d3   :  { %v2499_v36 = vpop.f32.mrb[53].mxu0 }
 0x2d4   :  { %v2954_v23 = vpack.c.bf16 %v2499_v36, %v2497_v17  ;;  %v2501_v12 = vpop.f32.mrb[54].mxu0 }
 0x2d5   :  { %v2503_v26 = vpop.f32.mrb[55].mxu0 }
 0x2d6   :  { %2632 = vst [vmem:[#allocation8 + $0x50] sm:$0xff] %v2954_v23  ;;  %v2955_v48 = vpack.c.bf16 %v2503_v26, %v2501_v12 }
 0x2d8   :  { %2633 = vst [vmem:[#allocation8 + $0x58] sm:$0xff] %v2955_v48 }
 0x2da   :  { %v2507_v31 = vpop.f32.mrb[56].mxu0 }
 0x2db   :  { %v2509_v56 = vpop.f32.mrb[57].mxu0 }
 0x2dc   :  { %v2956_v35 = vpack.c.bf16 %v2509_v56, %v2507_v31  ;;  %v2511_v5 = vpop.f32.mrb[58].mxu0 }
 0x2dd   :  { %v2513_v19 = vpop.f32.mrb[59].mxu0 }
 0x2de   :  { %2634 = vst [vmem:[#allocation8 + $0x60] sm:$0xff] %v2956_v35  ;;  %v2957_v49 = vpack.c.bf16 %v2513_v19, %v2511_v5 }
 0x2e0   :  { %2635 = vst [vmem:[#allocation8 + $0x68] sm:$0xff] %v2957_v49 }
 0x2e2   :  { %v2517_v37 = vpop.f32.mrb[60].mxu0 }
 0x2e3   :  { %v2519_v11 = vpop.f32.mrb[61].mxu0 }
 0x2e4   :  { %v2958_v9 = vpack.c.bf16 %v2519_v11, %v2517_v37  ;;  %v2521_v10 = vpop.f32.mrb[62].mxu0 }
 0x2e5   :  { %v2523_v60 = vpop.f32.mrb[63].mxu0 }
 0x2e6   :  { %2636 = vst [vmem:[#allocation8 + $0x70] sm:$0xff] %v2958_v9  ;;  %v2959_v1 = vpack.c.bf16 %v2523_v60, %v2521_v10 }
 0x2e8   :  { %2637 = vst [vmem:[#allocation8 + $0x78] sm:$0xff] %v2959_v1 }
 0x2e9   :  { %3454 = shalt.err (!%p3451_p0)
}
 0x2ea   :  { %s3455_s27 = scalar_lea.hbm %s4006_s3, 2048 }
 0x2eb   :  { %p3456_p1 = scmp.ne.s32.totalorder %s4006_s3, %s3455_s27  ;;  %p3459_p2 = scmp.lt.u32.totalorder %s3455_s27, %s4006_s3 }
 0x2ed   :  { %p3461_p3 = pnand %p3459_p2, %p3456_p1 }
 0x2ef   :  { %3464 = shalt.err (!%p3461_p3)
}
 0x2f0   :  { %2649 = dma.vmem_to_hbm [thread:$0]  %s2644_s23, 2048, %s4006_s3, [#allocation4], %s3475_s1, %s3475_s1, %s3476_s9  }
 0x2f1   :  { %3469 = dma.done.wait [#allocation4], 2048  }
 0x2f2   :  { %3470 = vsyncadd [#allocation4], 4294965248 }
 0x2f3   :  { %2653 = vsyncpa [#allocation3], 1 }
 0x2f4   :  { %2654 = vsyncpa [#allocation6], 1 }
 0x2f5   :  { %2655 = vsyncpa [#allocation4], 1 }

</bundles_post_ra>
